<compile_context>
chip_gen: v7x
topology: tpu7x:2x2x1
jax: 0.10.0
libtpu: 0.0.40
codegen_flags: <defaults>
</compile_context>

<pallas_src>
import functools

import numpy as np

import jax
import jax.numpy as jnp
from jax import lax
from jax.experimental import pallas as pl
from jax.experimental.pallas import tpu as pltpu


_GATHER_BLK = 16      # rows per blocked gather store (= one native bf16 tile)


def _round_up(x, m):
    return ((x + m - 1) // m) * m


def _pad2(x, rows, cols):
    out = jnp.zeros((rows, cols), x.dtype)
    return out.at[:x.shape[0], :x.shape[1]].set(x)


def _vmem_cap_bytes():
    try:
        cap = int(pltpu.get_tpu_info().vmem_capacity_bytes)
        if cap > 0:
            return cap
    except Exception:
        pass
    return 64 << 20   # conservative fallback (v7x-sized VMEM)


# --------------------------- shared kernel tail ---------------------------- #
def _atoms_and_readout(m2a_bf16, af_ref, woa_ref, wom_ref, bo_ref,
                       rsum_ref, inv_ref, gf_ref, out_ref):
    # atoms_hidden = relu([atom_feats | messages_to_atoms] @ W_o^T + b_o)
    # (the concat-matmul is split into two MXU matmuls)
    atoms_hidden = jnp.maximum(
        jnp.dot(af_ref[...], woa_ref[...], preferred_element_type=jnp.float32)
        + jnp.dot(m2a_bf16, wom_ref[...], preferred_element_type=jnp.float32)
        + bo_ref[...],
        0.0)
    # mean readout: 0/1 molecule-membership matmul (bf16 MXU, f32 acc); the
    # exact 1/count scaling is applied in f32; global features are fused in.
    sums = jnp.dot(rsum_ref[...], atoms_hidden.astype(jnp.bfloat16),
                   preferred_element_type=jnp.float32)
    out_ref[...] = sums * inv_ref[...] + gf_ref[...]


# ----------------------- dense (MXU aggregation) path ---------------------- #
def _dmpnn_kernel_dense(depth,
                        f_ref,      # VMEM bf16 [NB1P, CFP]
                        wi_ref,     # VMEM bf16 [CFP, HP]
                        wh_ref,     # VMEM bf16 [HP, HP]
                        cmap_ref,   # VMEM bf16 [NB1P, NB1P]  bond->bond counts
                        a2bm_ref,   # VMEM bf16 [NAP, NB1P]   atom->bond counts
                        af_ref,     # VMEM bf16 [NAP, AFP]
                        woa_ref,    # VMEM bf16 [AFP, WOUTP]
                        wom_ref,    # VMEM bf16 [HP, WOUTP]
                        bo_ref,     # VMEM f32  [1, WOUTP]
                        rsum_ref,   # VMEM bf16 [NMP, NAP]    0/1 membership
                        inv_ref,    # VMEM f32  [NMP, 1]      1/atom-count
                        gf_ref,     # VMEM f32  [NMP, WOUTP]
                        out_ref,    # VMEM f32  [NMP, WOUTP]
                        inp_ref,    # scratch f32 [NB1P, HP]
                        msg_ref):   # scratch bf16 [NB1P, HP]
    # input = W_i(f); message = relu(input)   (bf16 operands, f32 accumulate)
    inp_ref[...] = jnp.dot(f_ref[...], wi_ref[...],
                           preferred_element_type=jnp.float32)
    msg_ref[...] = jnp.maximum(inp_ref[...], 0.0).astype(jnp.bfloat16)

    # message passing: aggregation = count-matrix @ message on the MXU
    for _ in range(depth - 1):
        gathered = jnp.dot(cmap_ref[...], msg_ref[...],
                           preferred_element_type=jnp.float32)
        msg_ref[...] = jnp.maximum(
            inp_ref[...]
            + jnp.dot(gathered.astype(jnp.bfloat16), wh_ref[...],
                      preferred_element_type=jnp.float32),
            0.0).astype(jnp.bfloat16)

    # messages_to_atoms = h_message[atom_to_incoming_bonds].sum(1)
    m2a = jnp.dot(a2bm_ref[...], msg_ref[...],
                  preferred_element_type=jnp.float32)
    _atoms_and_readout(m2a.astype(jnp.bfloat16), af_ref, woa_ref, wom_ref,
                       bo_ref, rsum_ref, inv_ref, gf_ref, out_ref)


# --------------------- sparse (SMEM-index gather) path --------------------- #
def _dmpnn_kernel_sparse(depth, fan_bond, fan_atom, blk,
                         map_ref,    # SMEM int32 [NB1P*fan_bond]
                         a2b_ref,    # SMEM int32 [NAP*fan_atom]
                         f_ref, wi_ref, wh_ref,
                         af_ref, woa_ref, wom_ref, bo_ref,
                         rsum_ref, inv_ref, gf_ref, out_ref,
                         inp_ref,    # scratch f32  [NB1P, HP]
                         msg_ref,    # scratch f32  [NB1P, HP]
                         gath_ref,   # scratch bf16 [NB1P, HP]
                         m2a_ref):   # scratch bf16 [NAP, HP]
    inp_ref[...] = jnp.dot(f_ref[...], wi_ref[...],
                           preferred_element_type=jnp.float32)
    msg_ref[...] = jnp.maximum(inp_ref[...], 0.0)

    # sparse gather+sum:  dst[r] = sum_j src[idx[r, j]]
    # blocked: build one (blk, HP) tile in registers from per-row dynamic
    # loads, then a single aligned store; f32 accumulation, bf16 destination.
    def _gather_blocked(idx_ref, src_ref, dst_ref, fan):
        n_blocks = dst_ref.shape[0] // blk

        def body(rb, carry):
            r0 = pl.multiple_of(rb * blk, blk)
            rows = []
            for s in range(blk):
                base = (r0 + s) * fan
                acc = src_ref[pl.ds(idx_ref[base], 1), :]
                for j in range(1, fan):
                    acc = acc + src_ref[pl.ds(idx_ref[base + j], 1), :]
                rows.append(acc)
            tile = jnp.concatenate(rows, axis=0)
            dst_ref[pl.ds(r0, blk), :] = tile.astype(dst_ref.dtype)
            return carry

        unroll = 2 if (n_blocks % 2 == 0) else 1
        lax.fori_loop(0, n_blocks, body, 0, unroll=unroll)

    for _ in range(depth - 1):
        _gather_blocked(map_ref, msg_ref, gath_ref, fan_bond)
        msg_ref[...] = jnp.maximum(
            inp_ref[...]
            + jnp.dot(gath_ref[...], wh_ref[...],
                      preferred_element_type=jnp.float32),
            0.0)

    _gather_blocked(a2b_ref, msg_ref, m2a_ref, fan_atom)
    _atoms_and_readout(m2a_ref[...], af_ref, woa_ref, wom_ref, bo_ref,
                       rsum_ref, inv_ref, gf_ref, out_ref)


# ------------------------------ host wrapper ------------------------------- #
def dmpnn_encoder_forward(atom_features, f_ini_atoms_bonds,
                          atom_to_incoming_bonds, mapping, global_features,
                          molecules_unbatch_key, params, depth,
                          force_path=None):
    na, af = atom_features.shape
    nb1, cf = f_ini_atoms_bonds.shape
    h = params["wi_t"].shape[1]
    nm = len(molecules_unbatch_key)

    gf = global_features
    if gf.ndim == 1:
        gf = gf.reshape(nm, -1)
    gfd = gf.shape[1] if gf.shape[0] != 0 else 0

    fan_b = mapping.shape[1]
    fan_a = atom_to_incoming_bonds.shape[1]

    # Padded lane (128) / sublane extents.
    HP = _round_up(h, 128)
    CFP = _round_up(cf, 128)
    AFP = _round_up(af, 128)
    WOUT = h + gfd
    WOUTP = _round_up(max(WOUT, 1), 128)
    NAP = _round_up(na, _GATHER_BLK)
    NMP = _round_up(nm, 8)

    # Generation-aware VMEM budget and dense/sparse crossover.
    vmem_cap = _vmem_cap_bytes()
    dense_max = 2048 if vmem_cap <= (64 << 20) else 4096
    if force_path is None:
        use_dense = nb1 <= dense_max
    else:
        use_dense = (force_path == "dense")

    NB1P = _round_up(nb1, 128 if use_dense else _GATHER_BLK)

    # torch-style negative indexing: -1 means the last (zero-pad) bond row.
    pad_row = nb1 - 1
    mp = jnp.where(mapping < 0, pad_row, mapping).astype(jnp.int32)
    a2b = jnp.where(atom_to_incoming_bonds < 0, pad_row,
                    atom_to_incoming_bonds).astype(jnp.int32)

    # bf16, lane-padded matmul operands (zero padding keeps extra lanes exact).
    f_p = _pad2(f_ini_atoms_bonds.astype(jnp.bfloat16), NB1P, CFP)
    af_p = _pad2(atom_features.astype(jnp.bfloat16), NAP, AFP)
    wi_p = _pad2(params["wi_t"].astype(jnp.bfloat16), CFP, HP)
    wh_p = _pad2(params["wh_t"].astype(jnp.bfloat16), HP, HP)
    woa_p = _pad2(params["wo_a_t"].astype(jnp.bfloat16), AFP, WOUTP)
    wom_p = _pad2(params["wo_m_t"].astype(jnp.bfloat16), HP, WOUTP)
    bo_p = _pad2(params["bo"].astype(jnp.float32), 1, WOUTP)

    # Readout: 0/1 membership matrix (bf16, exact) + f32 1/count column.
    counts = np.asarray(molecules_unbatch_key, np.int32)
    mol_ids = np.repeat(np.arange(nm, dtype=np.int32), counts)
    rsum = np.zeros((NMP, NAP), np.float32)
    rsum[mol_ids, np.arange(na)] = 1.0
    rsum_p = jnp.asarray(rsum, jnp.bfloat16)
    inv = np.zeros((NMP, 1), np.float32)
    inv[:nm, 0] = 1.0 / np.maximum(counts, 1)   # zero-atom molecules -> 0 rows
    inv_p = jnp.asarray(inv)

    # Global features pre-placed in output columns [h, h+gfd) -> concat fused.
    gf_slab = jnp.zeros((NMP, WOUTP), jnp.float32)
    if gfd:
        gf_slab = gf_slab.at[:nm, h:h + gfd].set(gf.astype(jnp.float32))

    vmem = pl.BlockSpec(memory_space=pltpu.MemorySpace.VMEM)
    smem = pl.BlockSpec(memory_space=pltpu.MemorySpace.SMEM)

    if use_dense:
        # 0/1 (count) aggregation matrices; small-int values are exact in bf16.
        cmap = jnp.zeros((NB1P, NB1P), jnp.float32)
        cmap = cmap.at[jnp.arange(nb1)[:, None], mp].add(1.0)
        a2bm = jnp.zeros((NAP, NB1P), jnp.float32)
        a2bm = a2bm.at[jnp.arange(na)[:, None], a2b].add(1.0)
        cmap = cmap.astype(jnp.bfloat16)
        a2bm = a2bm.astype(jnp.bfloat16)

        kernel = functools.partial(_dmpnn_kernel_dense, depth)
        operands = (f_p, wi_p, wh_p, cmap, a2bm, af_p, woa_p, wom_p, bo_p,
                    rsum_p, inv_p, gf_slab)
        in_specs = [vmem] * len(operands)
        scratch = [pltpu.VMEM((NB1P, HP), jnp.float32),    # input (residual)
                   pltpu.VMEM((NB1P, HP), jnp.bfloat16)]   # message
        scratch_bytes = NB1P * HP * 4 + NB1P * HP * 2
        flops = 2 * (NB1P * CFP * HP
                     + (depth - 1) * (NB1P * NB1P * HP + NB1P * HP * HP)
                     + NAP * NB1P * HP
                     + NAP * (AFP + HP) * WOUTP
                     + NMP * NAP * WOUTP)
    else:
        # Index tables padded to the block size; pad rows point at the pad bond.
        mp_pad = jnp.full((NB1P, fan_b), pad_row, jnp.int32).at[:nb1].set(mp)
        a2b_pad = jnp.full((NAP, fan_a), pad_row, jnp.int32).at[:na].set(a2b)
        # TODO(synk): for index tables too large for SMEM, keep them in HBM
        # (pl.ANY) and DMA per-block chunks into SMEM scratch inside the loop.
        kernel = functools.partial(_dmpnn_kernel_sparse, depth, fan_b, fan_a,
                                   _GATHER_BLK)
        operands = (mp_pad.reshape(-1), a2b_pad.reshape(-1),
                    f_p, wi_p, wh_p, af_p, woa_p, wom_p, bo_p,
                    rsum_p, inv_p, gf_slab)
        in_specs = [smem, smem] + [vmem] * (len(operands) - 2)
        scratch = [pltpu.VMEM((NB1P, HP), jnp.float32),    # input (residual)
                   pltpu.VMEM((NB1P, HP), jnp.float32),    # message
                   pltpu.VMEM((NB1P, HP), jnp.bfloat16),   # gathered messages
                   pltpu.VMEM((NAP, HP), jnp.bfloat16)]    # messages-to-atoms
        scratch_bytes = NB1P * HP * (4 + 4 + 2) + NAP * HP * 2
        flops = 2 * (NB1P * CFP * HP
                     + (depth - 1) * NB1P * HP * HP
                     + NAP * (AFP + HP) * WOUTP
                     + NMP * NAP * WOUTP)

    in_bytes = sum(int(np.prod(x.shape)) * x.dtype.itemsize for x in operands)
    out_bytes = NMP * WOUTP * 4
    bytes_accessed = in_bytes + out_bytes
    vmem_limit = int(min(max(2 * (in_bytes + out_bytes) + scratch_bytes
                             + (8 << 20), 32 << 20),
                         int(vmem_cap * 0.85)))

    # TODO(synk): for very large graphs, stream f / messages over a row-block
    # grid (or pltpu.emit_pipeline) and split bond blocks across the two v7x
    # TensorCores; this single grid-less call runs on one TensorCore.
    out_padded = pl.pallas_call(
        kernel,
        out_shape=jax.ShapeDtypeStruct((NMP, WOUTP), jnp.float32),
        in_specs=in_specs,
        out_specs=vmem,
        scratch_shapes=scratch,
        compiler_params=pltpu.CompilerParams(vmem_limit_bytes=vmem_limit),
        cost_estimate=pl.CostEstimate(flops=int(flops), transcendentals=0,
                                      bytes_accessed=int(bytes_accessed)),
    )(*operands)

    return out_padded[:nm, :WOUT]


# --------------------------- pure-JAX references --------------------------- #
def ref_forward(atom_features, f_ini_atoms_bonds, atom_to_incoming_bonds,
                mapping, global_features, molecules_unbatch_key, params, depth,
                mixed=False):
    """mixed=False: exact f32 module semantics.  mixed=True: mirrors the dense
    kernel's mixed precision (bf16 matmul operands / bf16-resident messages,
    f32 accumulation)."""
    if mixed:
        cast = lambda x: x.astype(jnp.bfloat16)
        rnd = lambda x: x.astype(jnp.bfloat16).astype(jnp.float32)
    else:
        cast = lambda x: x
        rnd = lambda x: x
    dot = lambda a, b: jnp.dot(cast(a), cast(b),
                               preferred_element_type=jnp.float32)

    nb1 = f_ini_atoms_bonds.shape[0]
    # torch negative indexing: -1 == last row
    idx_map = jnp.where(mapping < 0, nb1 - 1, mapping)
    idx_a2b = jnp.where(atom_to_incoming_bonds < 0, nb1 - 1,
                        atom_to_incoming_bonds)

    inp = dot(f_ini_atoms_bonds, params["wi_t"])
    message = rnd(jax.nn.relu(inp))
    for _ in range(depth - 1):
        gathered = message[idx_map].sum(1)
        message = rnd(jax.nn.relu(inp + dot(gathered, params["wh_t"])))
    m2a = message[idx_a2b].sum(1)
    ah = jax.nn.relu(dot(atom_features, params["wo_a_t"])
                     + dot(m2a, params["wo_m_t"])
                     + params["bo"].astype(jnp.float32))
    ah = rnd(ah)
    mols, start = [], 0
    for c in molecules_unbatch_key:
        mols.append(ah[start:start + c].sum(0) / c)
        start += c
    out = jnp.stack(mols, 0)
    gf = global_features
    if gf.ndim == 1:
        gf = gf.reshape(len(molecules_unbatch_key), -1)
    if gf.shape[0] != 0:
        out = jnp.concatenate([out, gf], axis=1)
    return out


# --------------------------------- main ------------------------------------ #
if __name__ == "__main__":
    # Small synthetic graph batch consistent with the module's forward:
    #   use_default_fdim=False, atom_fdim=32, bond_fdim=16, d_hidden=64,
    #   depth=3, bias=False, activation='relu', dropout=0.0, aggregation='mean'
    ATOM_FDIM, BOND_FDIM, D_HIDDEN, DEPTH = 32, 16, 64, 3
    CONCAT_FDIM = ATOM_FDIM + BOND_FDIM
    molecules_unbatch_key = [10, 16, 14]
    N_ATOMS = sum(molecules_unbatch_key)          # 40
    N_BONDS = 87
    NB1 = N_BONDS + 1                             # +1 zero-padding bond row
    MAX_IN = 4
    N_MOLS, GF_DIM = len(molecules_unbatch_key), 12

    key = jax.random.PRNGKey(0)
    ks = jax.random.split(key, 10)

    atom_features = jax.random.normal(ks[0], (N_ATOMS, ATOM_FDIM), jnp.float32)
    f_ini_atoms_bonds = jax.random.normal(ks[1], (NB1, CONCAT_FDIM), jnp.float32)
    f_ini_atoms_bonds = f_ini_atoms_bonds.at[-1].set(0.0)      # h(-1) = 0 pad row

    # indices in [-1, NB1-1); -1 denotes the zero pad bond (torch's x[-1])
    atom_to_incoming_bonds = jax.random.randint(
        ks[2], (N_ATOMS, MAX_IN), -1, NB1 - 1)
    mapping = jax.random.randint(ks[3], (NB1, MAX_IN - 1), -1, NB1 - 1)
    mapping = mapping.at[-1].set(-1)                           # pad row maps to pad

    global_features = jax.random.normal(ks[4], (N_MOLS, GF_DIM), jnp.float32)

    # torch Linear weight is [out, in]; we store the transpose, bias=False for
    # W_i / W_h, bias for W_o, matching the module defaults.
    scale = 0.1
    wi_t = scale * jax.random.normal(ks[5], (CONCAT_FDIM, D_HIDDEN), jnp.float32)
    wh_t = scale * jax.random.normal(ks[6], (D_HIDDEN, D_HIDDEN), jnp.float32)
    wo_t = scale * jax.random.normal(ks[7], (ATOM_FDIM + D_HIDDEN, D_HIDDEN),
                                     jnp.float32)
    bo = scale * jax.random.normal(ks[8], (1, D_HIDDEN), jnp.float32)
    params = {
        "wi_t": wi_t,
        "wh_t": wh_t,
        "wo_a_t": wo_t[:ATOM_FDIM],     # rows acting on atom features
        "wo_m_t": wo_t[ATOM_FDIM:],     # rows acting on messages_to_atoms
        "bo": bo,
    }

    args = (atom_features, f_ini_atoms_bonds, atom_to_incoming_bonds, mapping,
            global_features, molecules_unbatch_key, params, DEPTH)

    # Default path: dense MXU aggregation (small/medium graphs).
    out_dense = jax.block_until_ready(dmpnn_encoder_forward(*args))
    assert out_dense.shape == (N_MOLS, D_HIDDEN + GF_DIM), out_dense.shape

    # Large-graph (SMEM blocked gather) path, exercised here for correctness.
    out_sparse = jax.block_until_ready(
        dmpnn_encoder_forward(*args, force_path="sparse"))
    assert out_sparse.shape == (N_MOLS, D_HIDDEN + GF_DIM), out_sparse.shape

    ref_mixed = ref_forward(*args, mixed=True)
    ref_f32 = ref_forward(*args, mixed=False)

    # (a) logic check vs. a JAX reference using the SAME mixed precision
    assert jnp.allclose(out_dense, ref_mixed, rtol=5e-3, atol=5e-3), \
        "dense-path kernel logic mismatch vs mixed-precision reference"
    # (b) semantics checks vs. the exact f32 module reference; the only
    #     expected difference is bf16 rounding of the MXU matmul operands.
    assert jnp.allclose(out_dense, ref_f32, rtol=5e-2, atol=5e-2), \
        "dense-path output drifted beyond bf16 mixed-precision tolerance"
    assert jnp.allclose(out_sparse, ref_f32, rtol=5e-2, atol=5e-2), \
        "sparse-path output drifted beyond bf16 mixed-precision tolerance"
    assert jnp.allclose(out_sparse, out_dense, rtol=3e-2, atol=3e-2), \
        "dense and sparse aggregation paths disagree"

    print("KERNEL_OK")
</pallas_src>

<mosaic_0001>
module attributes {stable_mosaic.version = 11 : i64} {
  func.func @_dmpnn_kernel_dense(%arg0: memref<128x128xbf16, #tpu.memory_space<vmem>>, %arg1: memref<128x128xbf16, #tpu.memory_space<vmem>>, %arg2: memref<128x128xbf16, #tpu.memory_space<vmem>>, %arg3: memref<128x128xbf16, #tpu.memory_space<vmem>>, %arg4: memref<48x128xbf16, #tpu.memory_space<vmem>>, %arg5: memref<48x128xbf16, #tpu.memory_space<vmem>>, %arg6: memref<128x128xbf16, #tpu.memory_space<vmem>>, %arg7: memref<128x128xbf16, #tpu.memory_space<vmem>>, %arg8: memref<1x128xf32, #tpu.memory_space<vmem>>, %arg9: memref<8x48xbf16, #tpu.memory_space<vmem>>, %arg10: memref<8x1xf32, #tpu.memory_space<vmem>>, %arg11: memref<8x128xf32, #tpu.memory_space<vmem>>, %arg12: memref<8x128xf32, #tpu.memory_space<vmem>>, %arg13: memref<128x128xf32, #tpu.memory_space<vmem>>, %arg14: memref<128x128xbf16, #tpu.memory_space<vmem>>) attributes {dimension_semantics = [], scalar_prefetch = 0 : i64, scratch_operands = 2 : i64, tpu.core_type = #tpu.core_type<tc>} {
    %c0 = arith.constant 0 : index
    %c0_0 = arith.constant 0 : index
    %0 = vector.load %arg0[%c0, %c0_0] : memref<128x128xbf16, #tpu.memory_space<vmem>>, vector<128x128xbf16>
    %c0_1 = arith.constant 0 : index
    %c0_2 = arith.constant 0 : index
    %1 = vector.load %arg1[%c0_1, %c0_2] : memref<128x128xbf16, #tpu.memory_space<vmem>>, vector<128x128xbf16>
    %cst = arith.constant dense<0.000000e+00> : vector<128x128xf32>
    %2 = tpu.matmul %0, %1, %cst {dimension_numbers = #tpu.dot_dimension_numbers<[1], [0], [0], [1], [0, 0, 1, 1], [], []>} : vector<128x128xbf16>, vector<128x128xbf16>, vector<128x128xf32> -> vector<128x128xf32>
    %c0_3 = arith.constant 0 : index
    %c0_4 = arith.constant 0 : index
    %3 = vector.load %arg13[%c0_3, %c0_4] : memref<128x128xf32, #tpu.memory_space<vmem>>, vector<128x128xf32>
    tpu.vector_store %arg13[%c0_3, %c0_4], %2 {strides = array<i32>} : memref<128x128xf32, #tpu.memory_space<vmem>>, vector<128x128xf32>,
    %c0_5 = arith.constant 0 : index
    %c0_6 = arith.constant 0 : index
    %4 = vector.load %arg13[%c0_5, %c0_6] : memref<128x128xf32, #tpu.memory_space<vmem>>, vector<128x128xf32>
    %cst_7 = arith.constant 0.000000e+00 : f32
    %5 = vector.broadcast %cst_7 : f32 to vector<128x128xf32>
    %6 = arith.maximumf %4, %5 : vector<128x128xf32>
    %7 = arith.truncf %6 : vector<128x128xf32> to vector<128x128xbf16>
    %c0_8 = arith.constant 0 : index
    %c0_9 = arith.constant 0 : index
    %8 = vector.load %arg14[%c0_8, %c0_9] : memref<128x128xbf16, #tpu.memory_space<vmem>>, vector<128x128xbf16>
    tpu.vector_store %arg14[%c0_8, %c0_9], %7 {strides = array<i32>} : memref<128x128xbf16, #tpu.memory_space<vmem>>, vector<128x128xbf16>,
    %c0_10 = arith.constant 0 : index
    %c0_11 = arith.constant 0 : index
    %9 = vector.load %arg3[%c0_10, %c0_11] : memref<128x128xbf16, #tpu.memory_space<vmem>>, vector<128x128xbf16>
    %c0_12 = arith.constant 0 : index
    %c0_13 = arith.constant 0 : index
    %10 = vector.load %arg14[%c0_12, %c0_13] : memref<128x128xbf16, #tpu.memory_space<vmem>>, vector<128x128xbf16>
    %cst_14 = arith.constant dense<0.000000e+00> : vector<128x128xf32>
    %11 = tpu.matmul %9, %10, %cst_14 {dimension_numbers = #tpu.dot_dimension_numbers<[1], [0], [0], [1], [0, 0, 1, 1], [], []>} : vector<128x128xbf16>, vector<128x128xbf16>, vector<128x128xf32> -> vector<128x128xf32>
    %c0_15 = arith.constant 0 : index
    %c0_16 = arith.constant 0 : index
    %12 = vector.load %arg13[%c0_15, %c0_16] : memref<128x128xf32, #tpu.memory_space<vmem>>, vector<128x128xf32>
    %13 = arith.truncf %11 : vector<128x128xf32> to vector<128x128xbf16>
    %c0_17 = arith.constant 0 : index
    %c0_18 = arith.constant 0 : index
    %14 = vector.load %arg2[%c0_17, %c0_18] : memref<128x128xbf16, #tpu.memory_space<vmem>>, vector<128x128xbf16>
    %cst_19 = arith.constant dense<0.000000e+00> : vector<128x128xf32>
    %15 = tpu.matmul %13, %14, %cst_19 {dimension_numbers = #tpu.dot_dimension_numbers<[1], [0], [0], [1], [0, 0, 1, 1], [], []>} : vector<128x128xbf16>, vector<128x128xbf16>, vector<128x128xf32> -> vector<128x128xf32>
    %16 = arith.addf %12, %15 : vector<128x128xf32>
    %cst_20 = arith.constant 0.000000e+00 : f32
    %17 = vector.broadcast %cst_20 : f32 to vector<128x128xf32>
    %18 = arith.maximumf %16, %17 : vector<128x128xf32>
    %19 = arith.truncf %18 : vector<128x128xf32> to vector<128x128xbf16>
    %c0_21 = arith.constant 0 : index
    %c0_22 = arith.constant 0 : index
    %20 = vector.load %arg14[%c0_21, %c0_22] : memref<128x128xbf16, #tpu.memory_space<vmem>>, vector<128x128xbf16>
    tpu.vector_store %arg14[%c0_21, %c0_22], %19 {strides = array<i32>} : memref<128x128xbf16, #tpu.memory_space<vmem>>, vector<128x128xbf16>,
    %c0_23 = arith.constant 0 : index
    %c0_24 = arith.constant 0 : index
    %21 = vector.load %arg3[%c0_23, %c0_24] : memref<128x128xbf16, #tpu.memory_space<vmem>>, vector<128x128xbf16>
    %c0_25 = arith.constant 0 : index
    %c0_26 = arith.constant 0 : index
    %22 = vector.load %arg14[%c0_25, %c0_26] : memref<128x128xbf16, #tpu.memory_space<vmem>>, vector<128x128xbf16>
    %cst_27 = arith.constant dense<0.000000e+00> : vector<128x128xf32>
    %23 = tpu.matmul %21, %22, %cst_27 {dimension_numbers = #tpu.dot_dimension_numbers<[1], [0], [0], [1], [0, 0, 1, 1], [], []>} : vector<128x128xbf16>, vector<128x128xbf16>, vector<128x128xf32> -> vector<128x128xf32>
    %c0_28 = arith.constant 0 : index
    %c0_29 = arith.constant 0 : index
    %24 = vector.load %arg13[%c0_28, %c0_29] : memref<128x128xf32, #tpu.memory_space<vmem>>, vector<128x128xf32>
    %25 = arith.truncf %23 : vector<128x128xf32> to vector<128x128xbf16>
    %c0_30 = arith.constant 0 : index
    %c0_31 = arith.constant 0 : index
    %26 = vector.load %arg2[%c0_30, %c0_31] : memref<128x128xbf16, #tpu.memory_space<vmem>>, vector<128x128xbf16>
    %cst_32 = arith.constant dense<0.000000e+00> : vector<128x128xf32>
    %27 = tpu.matmul %25, %26, %cst_32 {dimension_numbers = #tpu.dot_dimension_numbers<[1], [0], [0], [1], [0, 0, 1, 1], [], []>} : vector<128x128xbf16>, vector<128x128xbf16>, vector<128x128xf32> -> vector<128x128xf32>
    %28 = arith.addf %24, %27 : vector<128x128xf32>
    %cst_33 = arith.constant 0.000000e+00 : f32
    %29 = vector.broadcast %cst_33 : f32 to vector<128x128xf32>
    %30 = arith.maximumf %28, %29 : vector<128x128xf32>
    %31 = arith.truncf %30 : vector<128x128xf32> to vector<128x128xbf16>
    %c0_34 = arith.constant 0 : index
    %c0_35 = arith.constant 0 : index
    %32 = vector.load %arg14[%c0_34, %c0_35] : memref<128x128xbf16, #tpu.memory_space<vmem>>, vector<128x128xbf16>
    tpu.vector_store %arg14[%c0_34, %c0_35], %31 {strides = array<i32>} : memref<128x128xbf16, #tpu.memory_space<vmem>>, vector<128x128xbf16>,
    %c0_36 = arith.constant 0 : index
    %c0_37 = arith.constant 0 : index
    %33 = vector.load %arg4[%c0_36, %c0_37] : memref<48x128xbf16, #tpu.memory_space<vmem>>, vector<48x128xbf16>
    %c0_38 = arith.constant 0 : index
    %c0_39 = arith.constant 0 : index
    %34 = vector.load %arg14[%c0_38, %c0_39] : memref<128x128xbf16, #tpu.memory_space<vmem>>, vector<128x128xbf16>
    %cst_40 = arith.constant dense<0.000000e+00> : vector<48x128xf32>
    %35 = tpu.matmul %33, %34, %cst_40 {dimension_numbers = #tpu.dot_dimension_numbers<[1], [0], [0], [1], [0, 0, 1, 1], [], []>} : vector<48x128xbf16>, vector<128x128xbf16>, vector<48x128xf32> -> vector<48x128xf32>
    %36 = arith.truncf %35 : vector<48x128xf32> to vector<48x128xbf16>
    %c0_41 = arith.constant 0 : index
    %c0_42 = arith.constant 0 : index
    %37 = vector.load %arg5[%c0_41, %c0_42] : memref<48x128xbf16, #tpu.memory_space<vmem>>, vector<48x128xbf16>
    %c0_43 = arith.constant 0 : index
    %c0_44 = arith.constant 0 : index
    %38 = vector.load %arg6[%c0_43, %c0_44] : memref<128x128xbf16, #tpu.memory_space<vmem>>, vector<128x128xbf16>
    %cst_45 = arith.constant dense<0.000000e+00> : vector<48x128xf32>
    %39 = tpu.matmul %37, %38, %cst_45 {dimension_numbers = #tpu.dot_dimension_numbers<[1], [0], [0], [1], [0, 0, 1, 1], [], []>} : vector<48x128xbf16>, vector<128x128xbf16>, vector<48x128xf32> -> vector<48x128xf32>
    %c0_46 = arith.constant 0 : index
    %c0_47 = arith.constant 0 : index
    %40 = vector.load %arg7[%c0_46, %c0_47] : memref<128x128xbf16, #tpu.memory_space<vmem>>, vector<128x128xbf16>
    %cst_48 = arith.constant dense<0.000000e+00> : vector<48x128xf32>
    %41 = tpu.matmul %36, %40, %cst_48 {dimension_numbers = #tpu.dot_dimension_numbers<[1], [0], [0], [1], [0, 0, 1, 1], [], []>} : vector<48x128xbf16>, vector<128x128xbf16>, vector<48x128xf32> -> vector<48x128xf32>
    %42 = arith.addf %39, %41 : vector<48x128xf32>
    %c0_49 = arith.constant 0 : index
    %c0_50 = arith.constant 0 : index
    %43 = vector.load %arg8[%c0_49, %c0_50] : memref<1x128xf32, #tpu.memory_space<vmem>>, vector<1x128xf32>
    %44 = vector.broadcast %43 : vector<1x128xf32> to vector<48x128xf32>
    %45 = arith.addf %42, %44 : vector<48x128xf32>
    %cst_51 = arith.constant 0.000000e+00 : f32
    %46 = vector.broadcast %cst_51 : f32 to vector<48x128xf32>
    %47 = arith.maximumf %45, %46 : vector<48x128xf32>
    %c0_52 = arith.constant 0 : index
    %c0_53 = arith.constant 0 : index
    %48 = vector.load %arg9[%c0_52, %c0_53] : memref<8x48xbf16, #tpu.memory_space<vmem>>, vector<8x48xbf16>
    %49 = arith.truncf %47 : vector<48x128xf32> to vector<48x128xbf16>
    %cst_54 = arith.constant dense<0.000000e+00> : vector<8x128xf32>
    %50 = tpu.matmul %48, %49, %cst_54 {dimension_numbers = #tpu.dot_dimension_numbers<[1], [0], [0], [1], [0, 0, 1, 1], [], []>} : vector<8x48xbf16>, vector<48x128xbf16>, vector<8x128xf32> -> vector<8x128xf32>
    %c0_55 = arith.constant 0 : index
    %c0_56 = arith.constant 0 : index
    %51 = vector.load %arg10[%c0_55, %c0_56] : memref<8x1xf32, #tpu.memory_space<vmem>>, vector<8x1xf32>
    %52 = vector.broadcast %51 : vector<8x1xf32> to vector<8x128xf32>
    %53 = arith.mulf %50, %52 : vector<8x128xf32>
    %c0_57 = arith.constant 0 : index
    %c0_58 = arith.constant 0 : index
    %54 = vector.load %arg11[%c0_57, %c0_58] : memref<8x128xf32, #tpu.memory_space<vmem>>, vector<8x128xf32>
    %55 = arith.addf %53, %54 : vector<8x128xf32>
    %c0_59 = arith.constant 0 : index
    %c0_60 = arith.constant 0 : index
    %56 = vector.load %arg12[%c0_59, %c0_60] : memref<8x128xf32, #tpu.memory_space<vmem>>, vector<8x128xf32>
    tpu.vector_store %arg12[%c0_59, %c0_60], %55 {strides = array<i32>} : memref<8x128xf32, #tpu.memory_space<vmem>>, vector<8x128xf32>,
    return
  }
}

</mosaic_0001>

<bundles_post_ra>
// kernel: tpu_custom_call.1
= control target key start
LH: loop header
LB: loop body
LE: loop exit
PB: predicated region body
PF: predicated region fallthrough
CT: control target
= control target key end

     0   :  { %17 = vsyncpa [#allocation5], 0  ;;  %s2761_s0 = inlined_call_operand.hbm [shape: bf16[128,128], index: 0, kind: input, shape index: {}]   ;;  %s2762_s1 = inlined_call_operand.hbm [shape: bf16[128,128], index: 1, kind: input, shape index: {}]   ;;  %s2763_s2 = inlined_call_operand.hbm [shape: bf16[128,128], index: 2, kind: input, shape index: {}]   ;;  %s2764_s3 = inlined_call_operand.hbm [shape: bf16[128,128], index: 3, kind: input, shape index: {}]   ;;  %s2765_s4 = inlined_call_operand.vmem [shape: bf16[48,128], index: 4, kind: input, shape index: {}]   ;;  %s2766_s5 = inlined_call_operand.hbm [shape: bf16[48,128], index: 5, kind: input, shape index: {}]   ;;  %s2767_s6 = inlined_call_operand.hbm [shape: bf16[128,128], index: 6, kind: input, shape index: {}]   ;;  %s2768_s7 = inlined_call_operand.hbm [shape: bf16[128,128], index: 7, kind: input, shape index: {}]   ;;  %s2769_s8 = inlined_call_operand.vmem [shape: f32[1,128], index: 8, kind: input, shape index: {}]   ;;  %s2770_s9 = inlined_call_operand.vmem [shape: bf16[8,48], index: 9, kind: input, shape index: {}]   ;;  %s2771_s10 = inlined_call_operand.vmem [shape: f32[8,1], index: 10, kind: input, shape index: {}]   ;;  %s2772_s11 = inlined_call_operand.vmem [shape: f32[8,128], index: 11, kind: input, shape index: {}]   ;;  %s2773_s12 = inlined_call_operand.hbm [shape: f32[8,128], index: 12, kind: output, shape index: {}]  }
   0x1   :  { %18 = vsyncpa [#allocation8], 0 }
   0x2   :  { %19 = vsyncpa [#allocation11], 0 }
   0x3   :  { %20 = vsyncpa [#allocation14], 0 }
   0x4   :  { %21 = vsyncpa [#allocation6], 0  ;;  %s2397_s21 = smov [#allocation7]   ;;  %s2398_s23 = smov [#allocation10]  }
   0x5   :  { %s39_s22 = sshll.u32 %s2397_s21, 4  ;;  %s63_s24 = sshll.u32 %s2398_s23, 4  ;;  %s40_s22 = int_to_ptr.vmem [resolvable:$true] %s39_s22  ;;  %s2475_s24 = int_to_ptr.vmem [resolvable:$true] %s63_s24 }
   0x6   :  { %s2211_s27 = scalar_lea.hbm %s2762_s1, 1024 }
   0x7   :  { %p2212_p0 = scmp.ne.s32.totalorder %s2762_s1, %s2211_s27  ;;  %p2215_p1 = scmp.lt.u32.totalorder %s2211_s27, %s2762_s1 }
   0x9   :  { %p2217_p2 = pnand %p2215_p1, %p2212_p0 }
   0xb   :  { %2220 = shalt.err (!%p2217_p2)
}
   0xc   :  { %s2221_s14 = scalar_lea.vmem %s40_s22, 1024  ;;  %p2226_p4 = scmp.lt.s32.totalorder %s40_s22, %s40_s22 }
   0xd   :  { %p2222_p3 = scmp.ne.s32.totalorder %s40_s22, %s2221_s14  ;;  %p2227_p5 = scmp.lt.s32.totalorder %s2221_s14, %s2221_s14 }
   0xf   :  { %p2228_p6 = por %p2227_p5, %p2226_p4 }
  0x11   :  { %p2229_p7 = pnand %p2228_p6, %p2222_p3 }
  0x13   :  { %2232 = shalt.err (!%p2229_p7)
}
  0x14   :  { %s2399_s15 = smov 64   ;;  %s2400_s16 = smov 4  }
  0x15   :  { %45 = dma.hbm_to_vmem [thread:$0]  %s2762_s1, 1024, %s40_s22, [#allocation8], %s2399_s15, %s2399_s15, %s2400_s16  }
  0x16   :  { %s2233_s21 = scalar_lea.hbm %s2764_s3, 1024 }
  0x17   :  { %p2234_p8 = scmp.ne.s32.totalorder %s2764_s3, %s2233_s21  ;;  %p2237_p9 = scmp.lt.u32.totalorder %s2233_s21, %s2764_s3 }
  0x19   :  { %p2239_p10 = pnand %p2237_p9, %p2234_p8 }
  0x1b   :  { %2242 = shalt.err (!%p2239_p10)
}
  0x1c   :  { %s2243_s28 = scalar_lea.vmem %s2475_s24, 1024  ;;  %p2248_p12 = scmp.lt.s32.totalorder %s2475_s24, %s2475_s24 }
  0x1d   :  { %p2244_p11 = scmp.ne.s32.totalorder %s2475_s24, %s2243_s28  ;;  %p2249_p13 = scmp.lt.s32.totalorder %s2243_s28, %s2243_s28 }
  0x1f   :  { %p2250_p0 = por %p2249_p13, %p2248_p12 }
  0x21   :  { %p2251_p1 = pnand %p2250_p0, %p2244_p11 }
  0x23   :  { %2254 = shalt.err (!%p2251_p1)
}
  0x24   :  { %69 = dma.hbm_to_vmem [thread:$0]  %s2764_s3, 1024, %s2475_s24, [#allocation11], %s2399_s15, %s2399_s15, %s2400_s16  }
  0x25   :  { %s2401_s29 = smov [#allocation13]   ;;  %s2402_s13 = smov [#allocation4]  }
  0x26   :  { %s89_s30 = sshll.u32 %s2401_s29, 4  ;;  %s27_s14 = sshll.u32 %s2402_s13, 4  ;;  %s90_s30 = int_to_ptr.vmem [resolvable:$true] %s89_s30  ;;  %s2512_s14 = int_to_ptr.vmem [resolvable:$true] %s27_s14 }
  0x27   :  { %s2255_s19 = scalar_lea.hbm %s2767_s6, 1024 }
  0x28   :  { %p2256_p2 = scmp.ne.s32.totalorder %s2767_s6, %s2255_s19  ;;  %p2259_p3 = scmp.lt.u32.totalorder %s2255_s19, %s2767_s6 }
  0x2a   :  { %p2261_p4 = pnand %p2259_p3, %p2256_p2 }
  0x2c   :  { %2264 = shalt.err (!%p2261_p4)
}
  0x2d   :  { %s2265_s3 = scalar_lea.vmem %s90_s30, 1024  ;;  %p2270_p6 = scmp.lt.s32.totalorder %s90_s30, %s90_s30 }
  0x2e   :  { %p2266_p5 = scmp.ne.s32.totalorder %s90_s30, %s2265_s3  ;;  %p2271_p7 = scmp.lt.s32.totalorder %s2265_s3, %s2265_s3 }
  0x30   :  { %p2272_p8 = por %p2271_p7, %p2270_p6 }
  0x32   :  { %p2273_p9 = pnand %p2272_p8, %p2266_p5 }
  0x34   :  { %2276 = shalt.err (!%p2273_p9)
}
  0x35   :  { %95 = dma.hbm_to_vmem [thread:$0]  %s2767_s6, 1024, %s90_s30, [#allocation14], %s2399_s15, %s2399_s15, %s2400_s16  }
  0x36   :  { %s2277_s1 = scalar_lea.hbm %s2761_s0, 1024 }
  0x37   :  { %p2278_p10 = scmp.ne.s32.totalorder %s2761_s0, %s2277_s1  ;;  %p2281_p11 = scmp.lt.u32.totalorder %s2277_s1, %s2761_s0 }
  0x39   :  { %p2283_p12 = pnand %p2281_p11, %p2278_p10 }
  0x3b   :  { %2286 = shalt.err (!%p2283_p12)
}
  0x3c   :  { %s2287_s18 = scalar_lea.vmem %s2512_s14, 1024  ;;  %p2292_p0 = scmp.lt.s32.totalorder %s2512_s14, %s2512_s14 }
  0x3d   :  { %p2288_p13 = scmp.ne.s32.totalorder %s2512_s14, %s2287_s18  ;;  %p2293_p1 = scmp.lt.s32.totalorder %s2287_s18, %s2287_s18 }
  0x3f   :  { %p2294_p2 = por %p2293_p1, %p2292_p0 }
  0x41   :  { %p2295_p3 = pnand %p2294_p2, %p2288_p13 }
  0x43   :  { %2298 = shalt.err (!%p2295_p3)
}
  0x44   :  { %33 = dma.hbm_to_vmem [thread:$0]  %s2761_s0, 1024, %s2512_s14, [#allocation5], %s2399_s15, %s2399_s15, %s2400_s16  }
  0x45   :  { %s2403_s19 = smov [#allocation9]   ;;  %s2404_s21 = smov [#allocation12]  }
  0x46   :  { %s51_s20 = sshll.u32 %s2403_s19, 4  ;;  %s77_s23 = sshll.u32 %s2404_s21, 4  ;;  %s52_s20 = int_to_ptr.vmem [resolvable:$true] %s51_s20  ;;  %s2549_s23 = int_to_ptr.vmem [resolvable:$true] %s77_s23 }
  0x47   :  { %s2299_s24 = scalar_lea.hbm %s2763_s2, 1024 }
  0x48   :  { %p2300_p4 = scmp.ne.s32.totalorder %s2763_s2, %s2299_s24  ;;  %p2303_p5 = scmp.lt.u32.totalorder %s2299_s24, %s2763_s2 }
  0x4a   :  { %p2305_p6 = pnand %p2303_p5, %p2300_p4 }
  0x4c   :  { %2308 = shalt.err (!%p2305_p6)
}
  0x4d   :  { %s2309_s0 = scalar_lea.vmem %s52_s20, 1024  ;;  %p2314_p8 = scmp.lt.s32.totalorder %s52_s20, %s52_s20 }
  0x4e   :  { %p2310_p7 = scmp.ne.s32.totalorder %s52_s20, %s2309_s0  ;;  %p2315_p9 = scmp.lt.s32.totalorder %s2309_s0, %s2309_s0 }
  0x50   :  { %p2316_p10 = por %p2315_p9, %p2314_p8 }
  0x52   :  { %p2317_p11 = pnand %p2316_p10, %p2310_p7 }
  0x54   :  { %2320 = shalt.err (!%p2317_p11)
}
  0x55   :  { %57 = dma.hbm_to_vmem [thread:$0]  %s2763_s2, 1024, %s52_s20, [#allocation8], %s2399_s15, %s2399_s15, %s2400_s16  }
  0x56   :  { %s2321_s17 = scalar_lea.hbm %s2766_s5, 384 }
  0x57   :  { %p2322_p12 = scmp.ne.s32.totalorder %s2766_s5, %s2321_s17  ;;  %p2325_p13 = scmp.lt.u32.totalorder %s2321_s17, %s2766_s5 }
  0x59   :  { %p2327_p0 = pnand %p2325_p13, %p2322_p12 }
  0x5b   :  { %2330 = shalt.err (!%p2327_p0)
}
  0x5c   :  { %s2331_s21 = scalar_lea.vmem %s2549_s23, 384  ;;  %p2336_p2 = scmp.lt.s32.totalorder %s2549_s23, %s2549_s23 }
  0x5d   :  { %p2332_p1 = scmp.ne.s32.totalorder %s2549_s23, %s2331_s21  ;;  %p2337_p3 = scmp.lt.s32.totalorder %s2331_s21, %s2331_s21 }
  0x5f   :  { %p2338_p4 = por %p2337_p3, %p2336_p2 }
  0x61   :  { %p2339_p5 = pnand %p2338_p4, %p2332_p1 }
  0x63   :  { %2342 = shalt.err (!%p2339_p5)
}
  0x64   :  { %83 = dma.hbm_to_vmem [thread:$0]  %s2766_s5, 384, %s2549_s23, [#allocation11], %s2399_s15, %s2399_s15, %s2400_s16  }
  0x65   :  { %s2405_s25 = smov [#allocation15]   ;;  %s2343_s27 = scalar_lea.hbm %s2768_s7, 1024 }
  0x66   :  { %s101_s3 = sshll.u32 %s2405_s25, 4  ;;  %p2344_p6 = scmp.ne.s32.totalorder %s2768_s7, %s2343_s27  ;;  %s102_s3 = int_to_ptr.vmem [resolvable:$true] %s101_s3 }
  0x67   :  { %p2347_p7 = scmp.lt.u32.totalorder %s2343_s27, %s2768_s7 }
  0x69   :  { %p2349_p8 = pnand %p2347_p7, %p2344_p6 }
  0x6b   :  { %2352 = shalt.err (!%p2349_p8)
}
  0x6c   :  { %s2353_s22 = scalar_lea.vmem %s102_s3, 1024  ;;  %p2358_p10 = scmp.lt.s32.totalorder %s102_s3, %s102_s3 }
  0x6d   :  { %p2354_p9 = scmp.ne.s32.totalorder %s102_s3, %s2353_s22  ;;  %p2359_p11 = scmp.lt.s32.totalorder %s2353_s22, %s2353_s22 }
  0x6f   :  { %p2360_p12 = por %p2359_p11, %p2358_p10 }
  0x71   :  { %p2361_p13 = pnand %p2360_p12, %p2354_p9 }
  0x73   :  { %2364 = shalt.err (!%p2361_p13)
}
  0x74   :  { %107 = dma.hbm_to_vmem [thread:$0]  %s2768_s7, 1024, %s102_s3, [#allocation14], %s2399_s15, %s2399_s15, %s2400_s16  }
  0x75   :  { %2387 = dma.done.wait [#allocation5], 1024  }
  0x76   :  { %2388 = vsyncadd [#allocation5], 4294966272 }
  0x77   :  { %2389 = dma.done.wait [#allocation8], 2048  }
  0x78   :  { %2390 = vsyncadd [#allocation8], 4294965248 }
  0x79   :  { %2391 = dma.done.wait [#allocation11], 1408  }
  0x7a   :  { %2392 = vsyncadd [#allocation11], 4294965888 }
  0x7b   :  { %2393 = dma.done.wait [#allocation14], 2048  }
  0x7c   :  { %2394 = vsyncadd [#allocation14], 4294965248  ;;  %v2141_v0 = vld [vmem:[#allocation7] sm:$0xff]   ;;  %v2142_v1 = vld [vmem:[#allocation7 + $0x8] sm:$0xff]   ;;  %vm2407_vm0 = vmmov 0   ;;  %vm1612_vm1 = vcmask 392192  }
  0x7d   :  { %1873 = vmatprep.subr.bf16.mxu0 %v2141_v0  ;;  %v2143_v2 = vld [vmem:[#allocation7 + $0x10] sm:$0xff]   ;;  %v2144_v3 = vld [vmem:[#allocation7 + $0x18] sm:$0xff]   ;;  %v2149_v4 = vld [vmem:[#allocation4] sm:$0xff]   ;;  %s2409_s2 = smov [#allocation16]  }
  0x7e   :  { %1874 = vmatpush3.bf16.msra.mxu0 %v2141_v0  ;;  %1889 = vmatprep.mubr.bf16.mxu0 %v2149_v4  ;;  %v2145_v5 = vld [vmem:[#allocation7 + $0x20] sm:$0xff]   ;;  %v2146_v6 = vld [vmem:[#allocation7 + $0x28] sm:$0xff]   ;;  %v2147_v7 = vld [vmem:[#allocation7 + $0x30] sm:$0xff]   ;;  %s1672_s20 = sshll.u32 %s2409_s2, 4  ;;  %s1673_s20 = int_to_ptr.vmem [resolvable:$true] %s1672_s20 }
  0x7f   :  { %1875 = vmatprep.subr.bf16.mxu0 %v2142_v1  ;;  %v2148_v8 = vld [vmem:[#allocation7 + $0x38] sm:$0xff]   ;;  %v2150_v9 = vld [vmem:[#allocation4 + $0x8] sm:$0xff]   ;;  %v2151_v10 = vld [vmem:[#allocation4 + $0x10] sm:$0xff]   ;;  %s2365_s25 = scalar_lea.vmem %s1673_s20, 128  ;;  %p2370_p1 = scmp.lt.s32.totalorder %s1673_s20, %s1673_s20 }
  0x80   :  { %v2152_v11 = vld [vmem:[#allocation4 + $0x18] sm:$0xff]   ;;  %v2153_v12 = vld [vmem:[#allocation4 + $0x20] sm:$0xff]   ;;  %v2154_v13 = vld [vmem:[#allocation4 + $0x28] sm:$0xff]   ;;  %p2366_p0 = scmp.ne.s32.totalorder %s1673_s20, %s2365_s25  ;;  %p2371_p2 = scmp.lt.s32.totalorder %s2365_s25, %s2365_s25 }
  0x81   :  { %v2155_v14 = vld [vmem:[#allocation4 + $0x30] sm:$0xff]   ;;  %v2156_v15 = vld [vmem:[#allocation4 + $0x38] sm:$0xff]   ;;  %v2157_v16 = vld [vmem:[#allocation10] sm:$0xff]  }
  0x82   :  { %1876 = vmatpush3.bf16.msra.mxu0 %v2142_v1  ;;  %1921 = vmatprep.mubr.bf16.mxu1 %v2157_v16  ;;  %v2165_v17 = vld [vmem:[#allocation9] sm:$0xff]   ;;  %v2166_v18 = vld [vmem:[#allocation9 + $0x8] sm:$0xff]   ;;  %v2167_v19 = vld [vmem:[#allocation9 + $0x10] sm:$0xff]   ;;  %p2372_p3 = por %p2371_p2, %p2370_p1 }
  0x83   :  { %1877 = vmatprep.subr.bf16.mxu0 %v2143_v2  ;;  %v2168_v20 = vld [vmem:[#allocation9 + $0x18] sm:$0xff]   ;;  %v2169_v21 = vld [vmem:[#allocation9 + $0x20] sm:$0xff]   ;;  %v2170_v22 = vld [vmem:[#allocation9 + $0x28] sm:$0xff]  }
  0x84   :  { %v2171_v23 = vld [vmem:[#allocation9 + $0x30] sm:$0xff]   ;;  %v2158_v0 = vld [vmem:[#allocation10 + $0x8] sm:$0xff]   ;;  %p2373_p4 = pnand %p2372_p3, %p2366_p0 }
  0x85   :  { %v2159_v1 = vld [vmem:[#allocation10 + $0x10] sm:$0xff]   ;;  %v2162_v4 = vld [vmem:[#allocation10 + $0x28] sm:$0xff]  }
  0x86   :  { %1878 = vmatpush3.bf16.msra.mxu0 %v2143_v2  ;;  %v2160_v2 = vld [vmem:[#allocation10 + $0x18] sm:$0xff]  }
  0x87   :  { %1879 = vmatprep.subr.bf16.mxu0 %v2144_v3 }
  0x8a   :  { %1880 = vmatpush3.bf16.msra.mxu0 %v2144_v3  ;;  %v2161_v3 = vld [vmem:[#allocation10 + $0x20] sm:$0xff]  }
  0x8b   :  { %1881 = vmatprep.subr.bf16.mxu0 %v2145_v5 }
  0x8e   :  { %1882 = vmatpush3.bf16.msra.mxu0 %v2145_v5  ;;  %v2163_v5 = vld [vmem:[#allocation10 + $0x30] sm:$0xff]  }
  0x8f   :  { %1883 = vmatprep.subr.bf16.mxu0 %v2146_v6 }
  0x92   :  { %1884 = vmatpush3.bf16.msra.mxu0 %v2146_v6  ;;  %v2164_v6 = vld [vmem:[#allocation10 + $0x38] sm:$0xff]  }
  0x93   :  { %1885 = vmatprep.subr.bf16.mxu0 %v2147_v7 }
  0x96   :  { %1886 = vmatpush3.bf16.msra.mxu0 %v2147_v7  ;;  %v2172_v7 = vld [vmem:[#allocation9 + $0x38] sm:$0xff]  }
  0x97   :  { %1887 = vmatprep.subr.bf16.mxu0 %v2148_v8 }
  0x9a   :  { %1888 = vmatpush3.bf16.msra.mxu0 %v2148_v8 }
  0x9b   :  { %1937 = vmatprep.subr.bf16.mxu0 %v2165_v17 }
  0x9d   :  { %1890 = vmatmul.mubr.bf16.vlgmr.msra.gmra.mrb[0].mxu0 %v2150_v9 }
  0x9e   :  { %1893 = vmatprep.mubr.bf16.mxu0 %v2151_v10  ;;  %1938 = vmatpush3.bf16.msra.mxu0 %v2165_v17 }
  0x9f   :  { %1939 = vmatprep.subr.bf16.mxu0 %v2166_v18 }
  0xa2   :  { %1940 = vmatpush3.bf16.msra.mxu0 %v2166_v18 }
  0xa3   :  { %1941 = vmatprep.subr.bf16.mxu0 %v2167_v19 }
  0xa5   :  { %1894 = vmatmul.mubr.bf16.gmra.mrb[4].mxu0 %v2152_v11 }
  0xa6   :  { %1897 = vmatprep.mubr.bf16.mxu0 %v2153_v12  ;;  %1942 = vmatpush3.bf16.msra.mxu0 %v2167_v19 }
  0xa7   :  { %1943 = vmatprep.subr.bf16.mxu0 %v2168_v20 }
  0xaa   :  { %1944 = vmatpush3.bf16.msra.mxu0 %v2168_v20 }
  0xab   :  { %1945 = vmatprep.subr.bf16.mxu0 %v2169_v21 }
  0xad   :  { %1898 = vmatmul.mubr.bf16.gmra.mrb[8].mxu0 %v2154_v13 }
  0xae   :  { %1901 = vmatprep.mubr.bf16.mxu0 %v2155_v14  ;;  %1946 = vmatpush3.bf16.msra.mxu0 %v2169_v21 }
  0xaf   :  { %1947 = vmatprep.subr.bf16.mxu0 %v2170_v22 }
  0xb2   :  { %1948 = vmatpush3.bf16.msra.mxu0 %v2170_v22 }
  0xb3   :  { %1949 = vmatprep.subr.bf16.mxu0 %v2171_v23 }
  0xb5   :  { %1902 = vmatmul.mubr.bf16.gmra.mrb[12].mxu0 %v2156_v15 }
  0xb6   :  { %1950 = vmatpush3.bf16.msra.mxu0 %v2171_v23 }
  0xb7   :  { %1951 = vmatprep.subr.bf16.mxu0 %v2172_v7 }
  0xba   :  { %1952 = vmatpush3.bf16.msra.mxu0 %v2172_v7 }
 0x170   :  { %v2601_v24 = vpop.f32.mrb[0].mxu0 }
 0x171   :  { %v2603_v25 = vpop.f32.mrb[1].mxu0  ;;  %v397_v27 = vmax.f32 %v2601_v24, 0.0 }
 0x172   :  { %v2605_v26 = vpop.f32.mrb[2].mxu0  ;;  %v395_v30 = vmax.f32 %v2603_v25, 0.0 }
 0x173   :  { %v398_v28 = vmax.f32 %v2605_v26, 0.0  ;;  %v2609_v29 = vpop.f32.mrb[3].mxu0 }
 0x174   :  { %v396_v31 = vmax.f32 %v2609_v29, 0.0 }
 0x175   :  { %v412_v32 = vpack.c.bf16 %v398_v28, %v397_v27 }
 0x176   :  { %v411_v33 = vpack.c.bf16 %v396_v31, %v395_v30 }
 0x178   :  { %v2613_v34 = vpop.f32.mrb[4].mxu0  ;;  %1905 = vmatprep.subr.bf16.mxu1 %v411_v33 }
 0x179   :  { %v2615_v35 = vpop.f32.mrb[5].mxu0  ;;  %1906 = vmatpush3.bf16.msra.mxu1 %v411_v33  ;;  %v401_v37 = vmax.f32 %v2613_v34, 0.0 }
 0x17a   :  { %v2617_v36 = vpop.f32.mrb[6].mxu0  ;;  %1907 = vmatprep.subr.bf16.mxu1 %v412_v32  ;;  %v399_v40 = vmax.f32 %v2615_v35, 0.0 }
 0x17b   :  { %v402_v38 = vmax.f32 %v2617_v36, 0.0  ;;  %v2621_v39 = vpop.f32.mrb[7].mxu0 }
 0x17c   :  { %v400_v41 = vmax.f32 %v2621_v39, 0.0 }
 0x17d   :  { %1908 = vmatpush3.bf16.msra.mxu1 %v412_v32  ;;  %v414_v42 = vpack.c.bf16 %v402_v38, %v401_v37 }
 0x17e   :  { %v413_v43 = vpack.c.bf16 %v400_v41, %v399_v40  ;;  %v2173_v40 = vld [vmem:[#allocation10] sm:$0xff]  }
 0x17f   :  { %v2181_v41 = vld [vmem:[#allocation9] sm:$0xff]  }
 0x180   :  { %v2625_v44 = vpop.f32.mrb[8].mxu0  ;;  %1909 = vmatprep.subr.bf16.mxu1 %v413_v43  ;;  %2001 = vmatprep.subr.bf16.mxu0 %v2181_v41 }
 0x181   :  { %v2627_v45 = vpop.f32.mrb[9].mxu0  ;;  %1910 = vmatpush3.bf16.msra.mxu1 %v413_v43  ;;  %v405_v47 = vmax.f32 %v2625_v44, 0.0  ;;  %v2183_v43 = vld [vmem:[#allocation9 + $0x10] sm:$0xff]  }
 0x182   :  { %v2629_v46 = vpop.f32.mrb[10].mxu0  ;;  %1911 = vmatprep.subr.bf16.mxu1 %v414_v42  ;;  %v403_v50 = vmax.f32 %v2627_v45, 0.0 }
 0x183   :  { %v406_v48 = vmax.f32 %v2629_v46, 0.0  ;;  %v2633_v49 = vpop.f32.mrb[11].mxu0 }
 0x184   :  { %v404_v51 = vmax.f32 %v2633_v49, 0.0 }
 0x185   :  { %1912 = vmatpush3.bf16.msra.mxu1 %v414_v42  ;;  %v416_v52 = vpack.c.bf16 %v406_v48, %v405_v47  ;;  %v2182_v42 = vld [vmem:[#allocation9 + $0x8] sm:$0xff]   ;;  %v2184_v47 = vld [vmem:[#allocation9 + $0x18] sm:$0xff]   ;;  %v2185_v48 = vld [vmem:[#allocation9 + $0x20] sm:$0xff]  }
 0x186   :  { %v415_v53 = vpack.c.bf16 %v404_v51, %v403_v50  ;;  %v2186_v50 = vld [vmem:[#allocation9 + $0x28] sm:$0xff]   ;;  %v2187_v51 = vld [vmem:[#allocation9 + $0x30] sm:$0xff]  }
 0x188   :  { %v2637_v54 = vpop.f32.mrb[12].mxu0  ;;  %1913 = vmatprep.subr.bf16.mxu1 %v415_v53 }
 0x189   :  { %v2639_v55 = vpop.f32.mrb[13].mxu0  ;;  %1914 = vmatpush3.bf16.msra.mxu1 %v415_v53  ;;  %v409_v57 = vmax.f32 %v2637_v54, 0.0 }
 0x18a   :  { %v2641_v56 = vpop.f32.mrb[14].mxu0  ;;  %1915 = vmatprep.subr.bf16.mxu1 %v416_v52  ;;  %v407_v60 = vmax.f32 %v2639_v55, 0.0 }
 0x18b   :  { %v410_v58 = vmax.f32 %v2641_v56, 0.0  ;;  %v2645_v59 = vpop.f32.mrb[15].mxu0 }
 0x18c   :  { %v408_v61 = vmax.f32 %v2645_v59, 0.0 }
 0x18d   :  { %1916 = vmatpush3.bf16.msra.mxu1 %v416_v52  ;;  %v418_v62 = vpack.c.bf16 %v410_v58, %v409_v57 }
 0x18e   :  { %v417_v63 = vpack.c.bf16 %v408_v61, %v407_v60 }
 0x190   :  { %1917 = vmatprep.subr.bf16.mxu1 %v417_v63 }
 0x191   :  { %1918 = vmatpush3.bf16.msra.mxu1 %v417_v63 }
 0x192   :  { %1919 = vmatprep.subr.bf16.mxu1 %v418_v62 }
 0x195   :  { %1920 = vmatpush3.bf16.msra.mxu1 %v418_v62 }
 0x198   :  { %1922 = vmatmul.mubr.bf16.vlgmr.msra.gmra.mrb[0].mxu1 %v2158_v0 }
 0x199   :  { %1925 = vmatprep.mubr.bf16.mxu1 %v2159_v1 }
 0x1a0   :  { %1926 = vmatmul.mubr.bf16.gmra.mrb[4].mxu1 %v2160_v2 }
 0x1a1   :  { %1929 = vmatprep.mubr.bf16.mxu1 %v2161_v3 }
 0x1a8   :  { %1930 = vmatmul.mubr.bf16.gmra.mrb[8].mxu1 %v2162_v4 }
 0x1a9   :  { %1933 = vmatprep.mubr.bf16.mxu1 %v2163_v5 }
 0x1b0   :  { %1934 = vmatmul.mubr.bf16.gmra.mrb[12].mxu1 %v2164_v6 }
 0x1b1   :  { %1985 = vmatprep.mubr.bf16.mxu1 %v2173_v40 }
 0x26b   :  { %v1923_v8 = vpop.f32.mrb[0].mxu1 }
 0x26c   :  { %v533_v9 = vpop.f32.mrb[1].mxu1 }
 0x26d   :  { %v1924_v10 = vpop.f32.mrb[2].mxu1 }
 0x26e   :  { %v613_v11 = vpack.c.bf16 %v1924_v10, %v1923_v8  ;;  %v536_v12 = vpop.f32.mrb[3].mxu1 }
 0x26f   :  { %v612_v13 = vpack.c.bf16 %v536_v12, %v533_v9 }
 0x271   :  { %1953 = vmatprep.mubr.bf16.mxu0 %v612_v13 }
 0x272   :  { %1954 = vmatmul.mubr.bf16.vlgmr.msra.gmra.mrb[16].mxu0 %v613_v11 }
 0x273   :  { %v1927_v14 = vpop.f32.mrb[4].mxu1  ;;  %2002 = vmatpush3.bf16.msra.mxu0 %v2181_v41 }
 0x274   :  { %v549_v15 = vpop.f32.mrb[5].mxu1  ;;  %2003 = vmatprep.subr.bf16.mxu0 %v2182_v42 }
 0x275   :  { %v1928_v16 = vpop.f32.mrb[6].mxu1 }
 0x276   :  { %v615_v17 = vpack.c.bf16 %v1928_v16, %v1927_v14  ;;  %v552_v18 = vpop.f32.mrb[7].mxu1 }
 0x277   :  { %v614_v19 = vpack.c.bf16 %v552_v18, %v549_v15  ;;  %2004 = vmatpush3.bf16.msra.mxu0 %v2182_v42 }
 0x278   :  { %2005 = vmatprep.subr.bf16.mxu0 %v2183_v43 }
 0x279   :  { %1957 = vmatprep.mubr.bf16.mxu0 %v614_v19 }
 0x27a   :  { %1958 = vmatmul.mubr.bf16.gmra.mrb[20].mxu0 %v615_v17 }
 0x27b   :  { %v1931_v20 = vpop.f32.mrb[8].mxu1  ;;  %2006 = vmatpush3.bf16.msra.mxu0 %v2183_v43 }
 0x27c   :  { %v565_v21 = vpop.f32.mrb[9].mxu1  ;;  %2007 = vmatprep.subr.bf16.mxu0 %v2184_v47 }
 0x27d   :  { %v1932_v22 = vpop.f32.mrb[10].mxu1 }
 0x27e   :  { %v617_v23 = vpack.c.bf16 %v1932_v22, %v1931_v20  ;;  %v568_v27 = vpop.f32.mrb[11].mxu1 }
 0x27f   :  { %v616_v28 = vpack.c.bf16 %v568_v27, %v565_v21  ;;  %2008 = vmatpush3.bf16.msra.mxu0 %v2184_v47 }
 0x280   :  { %2009 = vmatprep.subr.bf16.mxu0 %v2185_v48 }
 0x281   :  { %1961 = vmatprep.mubr.bf16.mxu0 %v616_v28 }
 0x282   :  { %1962 = vmatmul.mubr.bf16.gmra.mrb[24].mxu0 %v617_v23 }
 0x283   :  { %v1935_v30 = vpop.f32.mrb[12].mxu1  ;;  %2010 = vmatpush3.bf16.msra.mxu0 %v2185_v48 }
 0x284   :  { %v581_v31 = vpop.f32.mrb[13].mxu1  ;;  %2011 = vmatprep.subr.bf16.mxu0 %v2186_v50 }
 0x285   :  { %v1936_v32 = vpop.f32.mrb[14].mxu1 }
 0x286   :  { %v619_v33 = vpack.c.bf16 %v1936_v32, %v1935_v30  ;;  %v584_v37 = vpop.f32.mrb[15].mxu1 }
 0x287   :  { %v618_v38 = vpack.c.bf16 %v584_v37, %v581_v31  ;;  %2012 = vmatpush3.bf16.msra.mxu0 %v2186_v50 }
 0x288   :  { %2013 = vmatprep.subr.bf16.mxu0 %v2187_v51 }
 0x289   :  { %1965 = vmatprep.mubr.bf16.mxu0 %v618_v38 }
 0x28a   :  { %1966 = vmatmul.mubr.bf16.gmra.mrb[28].mxu0 %v619_v33 }
 0x28b   :  { %2014 = vmatpush3.bf16.msra.mxu0 %v2187_v51 }
 0x345   :  { %v1955_v52 = vpop.f32.mrb[16].mxu0 }
 0x346   :  { %v783_v53 = vadd.f32 %v1955_v52, %v2601_v24  ;;  %v718_v57 = vpop.f32.mrb[17].mxu0 }
 0x347   :  { %v781_v58 = vadd.f32 %v718_v57, %v2603_v25  ;;  %v1956_v60 = vpop.f32.mrb[18].mxu0 }
 0x348   :  { %v784_v61 = vadd.f32 %v1956_v60, %v2605_v26  ;;  %v721_v62 = vpop.f32.mrb[19].mxu0  ;;  %v799_v0 = vmax.f32 %v783_v53, 0.0 }
 0x349   :  { %v782_v63 = vadd.f32 %v721_v62, %v2609_v29  ;;  %v797_v2 = vmax.f32 %v781_v58, 0.0 }
 0x34a   :  { %v800_v1 = vmax.f32 %v784_v61, 0.0 }
 0x34b   :  { %v798_v3 = vmax.f32 %v782_v63, 0.0 }
 0x34c   :  { %v814_v4 = vpack.c.bf16 %v800_v1, %v799_v0  ;;  %v2174_v0 = vld [vmem:[#allocation10 + $0x8] sm:$0xff]   ;;  %v2175_v1 = vld [vmem:[#allocation10 + $0x10] sm:$0xff]  }
 0x34d   :  { %v813_v5 = vpack.c.bf16 %v798_v3, %v797_v2  ;;  %v1959_v6 = vpop.f32.mrb[20].mxu0  ;;  %v2176_v2 = vld [vmem:[#allocation10 + $0x18] sm:$0xff]   ;;  %v2177_v3 = vld [vmem:[#allocation10 + $0x20] sm:$0xff]  }
 0x34e   :  { %v787_v7 = vadd.f32 %v1959_v6, %v2613_v34  ;;  %v734_v8 = vpop.f32.mrb[21].mxu0  ;;  %v2180_v6 = vld [vmem:[#allocation10 + $0x38] sm:$0xff]  }
 0x34f   :  { %v785_v9 = vadd.f32 %v734_v8, %v2615_v35  ;;  %v1960_v10 = vpop.f32.mrb[22].mxu0  ;;  %1969 = vmatprep.subr.bf16.mxu1 %v813_v5 }
 0x350   :  { %v788_v11 = vadd.f32 %v1960_v10, %v2617_v36  ;;  %v737_v12 = vpop.f32.mrb[23].mxu0  ;;  %1970 = vmatpush3.bf16.msra.mxu1 %v813_v5  ;;  %v803_v14 = vmax.f32 %v787_v7, 0.0  ;;  %v2179_v5 = vld [vmem:[#allocation10 + $0x30] sm:$0xff]   ;;  %v2188_v7 = vld [vmem:[#allocation9 + $0x38] sm:$0xff]  }
 0x351   :  { %v786_v13 = vadd.f32 %v737_v12, %v2621_v39  ;;  %1971 = vmatprep.subr.bf16.mxu1 %v814_v4  ;;  %v801_v16 = vmax.f32 %v785_v9, 0.0  ;;  %2015 = vmatprep.subr.bf16.mxu0 %v2188_v7 }
 0x352   :  { %v804_v15 = vmax.f32 %v788_v11, 0.0  ;;  %2016 = vmatpush3.bf16.msra.mxu0 %v2188_v7 }
 0x353   :  { %v802_v17 = vmax.f32 %v786_v13, 0.0 }
 0x354   :  { %v816_v18 = vpack.c.bf16 %v804_v15, %v803_v14  ;;  %1972 = vmatpush3.bf16.msra.mxu1 %v814_v4  ;;  %v2178_v4 = vld [vmem:[#allocation10 + $0x28] sm:$0xff]  }
 0x355   :  { %v815_v19 = vpack.c.bf16 %v802_v17, %v801_v16  ;;  %v1963_v20 = vpop.f32.mrb[24].mxu0 }
 0x356   :  { %v791_v21 = vadd.f32 %v1963_v20, %v2625_v44  ;;  %v750_v22 = vpop.f32.mrb[25].mxu0 }
 0x357   :  { %v789_v23 = vadd.f32 %v750_v22, %v2627_v45  ;;  %v1964_v27 = vpop.f32.mrb[26].mxu0  ;;  %1973 = vmatprep.subr.bf16.mxu1 %v815_v19 }
 0x358   :  { %v792_v28 = vadd.f32 %v1964_v27, %v2629_v46  ;;  %v753_v30 = vpop.f32.mrb[27].mxu0  ;;  %1974 = vmatpush3.bf16.msra.mxu1 %v815_v19  ;;  %v807_v32 = vmax.f32 %v791_v21, 0.0 }
 0x359   :  { %v790_v31 = vadd.f32 %v753_v30, %v2633_v49  ;;  %1975 = vmatprep.subr.bf16.mxu1 %v816_v18  ;;  %v805_v37 = vmax.f32 %v789_v23, 0.0 }
 0x35a   :  { %v808_v33 = vmax.f32 %v792_v28, 0.0 }
 0x35b   :  { %v806_v38 = vmax.f32 %v790_v31, 0.0 }
 0x35c   :  { %v818_v40 = vpack.c.bf16 %v808_v33, %v807_v32  ;;  %1976 = vmatpush3.bf16.msra.mxu1 %v816_v18 }
 0x35d   :  { %v817_v41 = vpack.c.bf16 %v806_v38, %v805_v37  ;;  %v1967_v42 = vpop.f32.mrb[28].mxu0 }
 0x35e   :  { %v795_v43 = vadd.f32 %v1967_v42, %v2637_v54  ;;  %v766_v47 = vpop.f32.mrb[29].mxu0  ;;  %v2195_v42 = vld [vmem:[#allocation15 + $0x8] sm:$0xff]  }
 0x35f   :  { %v793_v48 = vadd.f32 %v766_v47, %v2639_v55  ;;  %v1968_v50 = vpop.f32.mrb[30].mxu0  ;;  %1977 = vmatprep.subr.bf16.mxu1 %v817_v41  ;;  %v2199_v47 = vld [vmem:[#allocation15 + $0x18] sm:$0xff]  }
 0x360   :  { %v796_v51 = vadd.f32 %v1968_v50, %v2641_v56  ;;  %v769_v52 = vpop.f32.mrb[31].mxu0  ;;  %1978 = vmatpush3.bf16.msra.mxu1 %v817_v41  ;;  %v811_v57 = vmax.f32 %v795_v43, 0.0  ;;  %v2193_v41 = vld [vmem:[#allocation15] sm:$0xff]   ;;  %v2197_v43 = vld [vmem:[#allocation15 + $0x10] sm:$0xff]   ;;  %v2203_v50 = vld [vmem:[#allocation15 + $0x28] sm:$0xff]  }
 0x361   :  { %v794_v53 = vadd.f32 %v769_v52, %v2645_v59  ;;  %1979 = vmatprep.subr.bf16.mxu1 %v818_v40  ;;  %v809_v60 = vmax.f32 %v793_v48, 0.0  ;;  %v2201_v48 = vld [vmem:[#allocation15 + $0x20] sm:$0xff]  }
 0x362   :  { %v812_v58 = vmax.f32 %v796_v51, 0.0  ;;  %v2205_v51 = vld [vmem:[#allocation15 + $0x30] sm:$0xff]  }
 0x363   :  { %v810_v61 = vmax.f32 %v794_v53, 0.0 }
 0x364   :  { %v820_v62 = vpack.c.bf16 %v812_v58, %v811_v57  ;;  %1980 = vmatpush3.bf16.msra.mxu1 %v818_v40  ;;  %v2406_v40 = vmov 0.0  }
 0x365   :  { %v819_v63 = vpack.c.bf16 %v810_v61, %v809_v60  ;;  %2061 = vmatprep.subr.bf16.mxu0 %v2406_v40 }
 0x367   :  { %1981 = vmatprep.subr.bf16.mxu1 %v819_v63 }
 0x368   :  { %1982 = vmatpush3.bf16.msra.mxu1 %v819_v63 }
 0x369   :  { %1983 = vmatprep.subr.bf16.mxu1 %v820_v62 }
 0x36c   :  { %1984 = vmatpush3.bf16.msra.mxu1 %v820_v62 }
 0x36d   :  { %2033 = vmatprep.subr.bf16.mxu1 %v2406_v40 }
 0x36f   :  { %1986 = vmatmul.mubr.bf16.vlgmr.msra.gmra.mrb[16].mxu1 %v2174_v0 }
 0x370   :  { %1989 = vmatprep.mubr.bf16.mxu1 %v2175_v1 }
 0x377   :  { %1990 = vmatmul.mubr.bf16.gmra.mrb[20].mxu1 %v2176_v2 }
 0x378   :  { %1993 = vmatprep.mubr.bf16.mxu1 %v2177_v3 }
 0x37f   :  { %1994 = vmatmul.mubr.bf16.gmra.mrb[24].mxu1 %v2178_v4 }
 0x380   :  { %1997 = vmatprep.mubr.bf16.mxu1 %v2179_v5 }
 0x387   :  { %1998 = vmatmul.mubr.bf16.gmra.mrb[28].mxu1 %v2180_v6 }
 0x388   :  { %2049 = vmatprep.mubr.msk.bf16.mxu1 %vm2407_vm0, %v2406_v40 }
 0x442   :  { %v1987_v8 = vpop.f32.mrb[16].mxu1 }
 0x443   :  { %v935_v9 = vpop.f32.mrb[17].mxu1 }
 0x444   :  { %v1988_v10 = vpop.f32.mrb[18].mxu1 }
 0x445   :  { %v1015_v11 = vpack.c.bf16 %v1988_v10, %v1987_v8  ;;  %v938_v12 = vpop.f32.mrb[19].mxu1 }
 0x446   :  { %v1014_v13 = vpack.c.bf16 %v938_v12, %v935_v9 }
 0x448   :  { %2017 = vmatprep.mubr.bf16.mxu0 %v1014_v13 }
 0x449   :  { %2018 = vmatmul.mubr.bf16.vlgmr.msra.gmra.mrb[32].mxu0 %v1015_v11 }
 0x44a   :  { %v1991_v14 = vpop.f32.mrb[20].mxu1  ;;  %2062 = vmatpush3.bf16.msra.mxu0 %v2193_v41 }
 0x44b   :  { %v951_v15 = vpop.f32.mrb[21].mxu1  ;;  %2063 = vmatprep.subr.bf16.mxu0 %v2406_v40 }
 0x44c   :  { %v1992_v16 = vpop.f32.mrb[22].mxu1 }
 0x44d   :  { %v1017_v17 = vpack.c.bf16 %v1992_v16, %v1991_v14  ;;  %v954_v18 = vpop.f32.mrb[23].mxu1 }
 0x44e   :  { %v1016_v19 = vpack.c.bf16 %v954_v18, %v951_v15  ;;  %2064 = vmatpush3.bf16.msra.mxu0 %v2195_v42 }
 0x44f   :  { %2065 = vmatprep.subr.bf16.mxu0 %v2406_v40 }
 0x450   :  { %2021 = vmatprep.mubr.bf16.mxu0 %v1016_v19 }
 0x451   :  { %2022 = vmatmul.mubr.bf16.gmra.mrb[36].mxu0 %v1017_v17 }
 0x452   :  { %v1995_v20 = vpop.f32.mrb[24].mxu1  ;;  %2066 = vmatpush3.bf16.msra.mxu0 %v2197_v43 }
 0x453   :  { %v967_v21 = vpop.f32.mrb[25].mxu1  ;;  %2067 = vmatprep.subr.bf16.mxu0 %v2406_v40 }
 0x454   :  { %v1996_v22 = vpop.f32.mrb[26].mxu1 }
 0x455   :  { %v1019_v23 = vpack.c.bf16 %v1996_v22, %v1995_v20  ;;  %v970_v27 = vpop.f32.mrb[27].mxu1 }
 0x456   :  { %v1018_v28 = vpack.c.bf16 %v970_v27, %v967_v21  ;;  %2068 = vmatpush3.bf16.msra.mxu0 %v2199_v47  ;;  %v2190_v47 = vld [vmem:[%s2765_s4 + $0x8] sm:$0xff]  }
 0x457   :  { %2069 = vmatprep.subr.bf16.mxu0 %v2406_v40 }
 0x458   :  { %2025 = vmatprep.mubr.bf16.mxu0 %v1018_v28 }
 0x459   :  { %2026 = vmatmul.mubr.bf16.gmra.mrb[40].mxu0 %v1019_v23 }
 0x45a   :  { %v1999_v30 = vpop.f32.mrb[28].mxu1  ;;  %2070 = vmatpush3.bf16.msra.mxu0 %v2201_v48  ;;  %v2196_v48 = vld [vmem:[#allocation13 + $0x10] sm:$0xff]  }
 0x45b   :  { %v983_v31 = vpop.f32.mrb[29].mxu1  ;;  %2071 = vmatprep.subr.bf16.mxu0 %v2406_v40 }
 0x45c   :  { %v2000_v32 = vpop.f32.mrb[30].mxu1 }
 0x45d   :  { %v1021_v33 = vpack.c.bf16 %v2000_v32, %v1999_v30  ;;  %v986_v37 = vpop.f32.mrb[31].mxu1 }
 0x45e   :  { %v1020_v38 = vpack.c.bf16 %v986_v37, %v983_v31  ;;  %2072 = vmatpush3.bf16.msra.mxu0 %v2203_v50  ;;  %v2198_v50 = vld [vmem:[#allocation13 + $0x18] sm:$0xff]  }
 0x45f   :  { %2073 = vmatprep.subr.bf16.mxu0 %v2406_v40 }
 0x460   :  { %2029 = vmatprep.mubr.bf16.mxu0 %v1020_v38 }
 0x461   :  { %2030 = vmatmul.mubr.bf16.gmra.mrb[44].mxu0 %v1021_v33 }
 0x462   :  { %2077 = vmatprep.mubr.msk.bf16.mxu0 %vm2407_vm0, %v2406_v40  ;;  %2074 = vmatpush3.bf16.msra.mxu0 %v2205_v51  ;;  %v2191_v51 = vld [vmem:[%s2765_s4 + $0x10] sm:$0xff]  }
 0x463   :  { %2075 = vmatprep.subr.bf16.mxu0 %v2406_v40 }
 0x51c   :  { %v2019_v52 = vpop.f32.mrb[32].mxu0 }
 0x51d   :  { %v1185_v53 = vadd.f32 %v2019_v52, %v2601_v24  ;;  %v1120_v57 = vpop.f32.mrb[33].mxu0  ;;  %v2200_v52 = vld [vmem:[#allocation13 + $0x20] sm:$0xff]  }
 0x51e   :  { %v1183_v58 = vadd.f32 %v1120_v57, %v2603_v25  ;;  %v2020_v60 = vpop.f32.mrb[34].mxu0  ;;  %v2204_v57 = vld [vmem:[#allocation13 + $0x30] sm:$0xff]  }
 0x51f   :  { %v1186_v61 = vadd.f32 %v2020_v60, %v2605_v26  ;;  %v1123_v62 = vpop.f32.mrb[35].mxu0  ;;  %v1201_v0 = vmax.f32 %v1185_v53, 0.0  ;;  %v2202_v53 = vld [vmem:[#allocation13 + $0x28] sm:$0xff]   ;;  %v2207_v60 = vld [vmem:[#allocation15 + $0x38] sm:$0xff]  }
 0x520   :  { %v1184_v63 = vadd.f32 %v1123_v62, %v2609_v29  ;;  %v1199_v2 = vmax.f32 %v1183_v58, 0.0  ;;  %v2206_v58 = vld [vmem:[#allocation13 + $0x38] sm:$0xff]   ;;  %2076 = vmatpush3.bf16.msra.mxu0 %v2207_v60  ;;  %v2209_v62 = vld [vmem:[#allocation12 + $0x8] sm:$0xff]  }
 0x521   :  { %v1202_v1 = vmax.f32 %v1186_v61, 0.0  ;;  %v2208_v61 = vld [vmem:[#allocation12] sm:$0xff]   ;;  %2117 = vmatprep.subr.bf16.mxu0 %v2406_v40 }
 0x522   :  { %v1200_v3 = vmax.f32 %v1184_v63, 0.0  ;;  %v2210_v63 = vld [vmem:[#allocation12 + $0x10] sm:$0xff]  }
 0x523   :  { %v1216_v4 = vpack.c.bf16 %v1202_v1, %v1201_v0 }
 0x524   :  { %v1215_v5 = vpack.c.bf16 %v1200_v3, %v1199_v2  ;;  %v2023_v6 = vpop.f32.mrb[36].mxu0 }
 0x525   :  { %v1189_v7 = vadd.f32 %v2023_v6, %v2613_v34  ;;  %v1136_v8 = vpop.f32.mrb[37].mxu0 }
 0x526   :  { %v1187_v24 = vadd.f32 %v1136_v8, %v2615_v35  ;;  %v2024_v9 = vpop.f32.mrb[38].mxu0  ;;  %2034 = vmatpush3.bf16.msra.mxu1 %v1215_v5 }
 0x527   :  { %v1190_v25 = vadd.f32 %v2024_v9, %v2617_v36  ;;  %v1139_v26 = vpop.f32.mrb[39].mxu0  ;;  %2035 = vmatprep.subr.bf16.mxu1 %v2406_v40  ;;  %v1205_v10 = vmax.f32 %v1189_v7, 0.0 }
 0x528   :  { %v1188_v29 = vadd.f32 %v1139_v26, %v2621_v39  ;;  %v1203_v12 = vmax.f32 %v1187_v24, 0.0 }
 0x529   :  { %v1206_v11 = vmax.f32 %v1190_v25, 0.0 }
 0x52a   :  { %v1204_v13 = vmax.f32 %v1188_v29, 0.0  ;;  %2036 = vmatpush3.bf16.msra.mxu1 %v1216_v4 }
 0x52b   :  { %v1218_v14 = vpack.c.bf16 %v1206_v11, %v1205_v10  ;;  %2037 = vmatprep.subr.bf16.mxu1 %v2406_v40 }
 0x52c   :  { %v1217_v34 = vpack.c.bf16 %v1204_v13, %v1203_v12  ;;  %v2027_v15 = vpop.f32.mrb[40].mxu0 }
 0x52d   :  { %v1193_v35 = vadd.f32 %v2027_v15, %v2625_v44  ;;  %v1152_v16 = vpop.f32.mrb[41].mxu0 }
 0x52e   :  { %v1191_v36 = vadd.f32 %v1152_v16, %v2627_v45  ;;  %v2028_v17 = vpop.f32.mrb[42].mxu0  ;;  %2038 = vmatpush3.bf16.msra.mxu1 %v1217_v34 }
 0x52f   :  { %v1194_v18 = vadd.f32 %v2028_v17, %v2629_v46  ;;  %v1155_v39 = vpop.f32.mrb[43].mxu0  ;;  %2039 = vmatprep.subr.bf16.mxu1 %v2406_v40  ;;  %v1209_v20 = vmax.f32 %v1193_v35, 0.0 }
 0x530   :  { %v1192_v19 = vadd.f32 %v1155_v39, %v2633_v49  ;;  %v1207_v22 = vmax.f32 %v1191_v36, 0.0 }
 0x531   :  { %v1210_v21 = vmax.f32 %v1194_v18, 0.0 }
 0x532   :  { %v1208_v23 = vmax.f32 %v1192_v19, 0.0  ;;  %2040 = vmatpush3.bf16.msra.mxu1 %v1218_v14  ;;  %v1656_v19 = vld [vmem:[%s2771_s10] sm:$0xff] }
 0x533   :  { %v1220_v27 = vpack.c.bf16 %v1210_v21, %v1209_v20  ;;  %2041 = vmatprep.subr.bf16.mxu1 %v2406_v40  ;;  %v2408_v20 = vmov 0  }
 0x534   :  { %v1219_v44 = vpack.c.bf16 %v1208_v23, %v1207_v22  ;;  %v2031_v28 = vpop.f32.mrb[44].mxu0  ;;  %2140 = vset.pattern.permute.xlu0 %v2408_v20  ;;  %v1754_v22 = vld [vmem:[%s2769_s8] ss:$0 sm:$0xff] }
 0x535   :  { %v1197_v45 = vadd.f32 %v2031_v28, %v2637_v54  ;;  %v1168_v30 = vpop.f32.mrb[45].mxu0  ;;  %1659 = vperm.xlu0 %2140, %v1656_v19  }
 0x536   :  { %v1195_v46 = vadd.f32 %v1168_v30, %v2639_v55  ;;  %v2032_v31 = vpop.f32.mrb[46].mxu0  ;;  %2042 = vmatpush3.bf16.msra.mxu1 %v1219_v44  ;;  %v2189_v55 = vld [vmem:[%s2765_s4] sm:$0xff]  }
 0x537   :  { %v1198_v32 = vadd.f32 %v2032_v31, %v2641_v56  ;;  %v1171_v49 = vpop.f32.mrb[47].mxu0  ;;  %2043 = vmatprep.subr.bf16.mxu1 %v2406_v40  ;;  %v1213_v37 = vmax.f32 %v1197_v45, 0.0  ;;  %v2192_v56 = vld [vmem:[#allocation13] sm:$0xff]  }
 0x538   :  { %v1196_v33 = vadd.f32 %v1171_v49, %v2645_v59  ;;  %v1211_v41 = vmax.f32 %v1195_v46, 0.0  ;;  %v2194_v59 = vld [vmem:[#allocation13 + $0x8] sm:$0xff]  }
 0x539   :  { %v1214_v38 = vmax.f32 %v1198_v32, 0.0 }
 0x53a   :  { %v1212_v42 = vmax.f32 %v1196_v33, 0.0  ;;  %2044 = vmatpush3.bf16.msra.mxu1 %v1220_v27 }
 0x53b   :  { %v1222_v43 = vpack.c.bf16 %v1214_v38, %v1213_v37  ;;  %2045 = vmatprep.subr.bf16.mxu1 %v2406_v40 }
 0x53c   :  { %v1221_v54 = vpack.c.bf16 %v1212_v42, %v1211_v41 }
 0x53e   :  { %2046 = vmatpush3.bf16.msra.mxu1 %v1221_v54 }
 0x53f   :  { %2047 = vmatprep.subr.bf16.mxu1 %v2406_v40 }
 0x542   :  { %2048 = vmatpush3.bf16.msra.mxu1 %v1222_v43 }
 0x543   :  { %2089 = vmatprep.subr.bf16.mxu1 %v2406_v40 }
 0x545   :  { %2050 = vmatmul.mubr.bf16.vlgmr.msra.gmra.mrb[32].mxu1 %v2189_v55 }
 0x546   :  { %2053 = vmatprep.mubr.msk.bf16.mxu1 %vm2407_vm0, %v2406_v40  ;;  %2090 = vmatpush3.bf16.msra.mxu1 %v2192_v56 }
 0x547   :  { %2091 = vmatprep.subr.bf16.mxu1 %v2406_v40 }
 0x54a   :  { %2092 = vmatpush3.bf16.msra.mxu1 %v2194_v59 }
 0x54b   :  { %2093 = vmatprep.subr.bf16.mxu1 %v2406_v40 }
 0x54d   :  { %2054 = vmatmul.mubr.bf16.gmra.mrb[36].mxu1 %v2190_v47 }
 0x54e   :  { %2057 = vmatprep.mubr.msk.bf16.mxu1 %vm2407_vm0, %v2406_v40  ;;  %2094 = vmatpush3.bf16.msra.mxu1 %v2196_v48 }
 0x54f   :  { %2095 = vmatprep.subr.bf16.mxu1 %v2406_v40 }
 0x552   :  { %2096 = vmatpush3.bf16.msra.mxu1 %v2198_v50 }
 0x553   :  { %2097 = vmatprep.subr.bf16.mxu1 %v2406_v40 }
 0x555   :  { %2058 = vmatmul.mubr.bf16.gmra.mrb[40].mxu1 %v2191_v51 }
 0x556   :  { %2098 = vmatpush3.bf16.msra.mxu1 %v2200_v52  ;;  %2105 = vmatprep.mubr.msk.bf16.mxu1 %vm2407_vm0, %v2406_v40 }
 0x557   :  { %2099 = vmatprep.subr.bf16.mxu1 %v2406_v40 }
 0x55a   :  { %2100 = vmatpush3.bf16.msra.mxu1 %v2202_v53 }
 0x55b   :  { %2101 = vmatprep.subr.bf16.mxu1 %v2406_v40 }
 0x55e   :  { %2102 = vmatpush3.bf16.msra.mxu1 %v2204_v57 }
 0x55f   :  { %2103 = vmatprep.subr.bf16.mxu1 %v2406_v40 }
 0x562   :  { %2104 = vmatpush3.bf16.msra.mxu1 %v2206_v58 }
 0x565   :  { %2106 = vmatmul.mubr.bf16.vlgmr.msra.gmra.mrb[44].mxu1 %v2208_v61 }
 0x566   :  { %2109 = vmatprep.mubr.msk.bf16.mxu1 %vm2407_vm0, %v2406_v40 }
 0x56d   :  { %2110 = vmatmul.mubr.bf16.gmra.mrb[48].mxu1 %v2209_v62 }
 0x56e   :  { %2113 = vmatprep.mubr.msk.bf16.mxu1 %vm2407_vm0, %v2406_v40 }
 0x575   :  { %2114 = vmatmul.mubr.bf16.gmra.mrb[52].mxu1 %v2210_v63 }
 0x618   :  { %v1297_v0 = vpop.f32.mrb[32].mxu1 }
 0x619   :  { %v2051_v1 = vpop.f32.mrb[33].mxu1 }
 0x61a   :  { %v1300_v2 = vpop.f32.mrb[34].mxu1  ;;  %v1660_v1 = vpop.permute.xlu0 %1659 }
 0x61b   :  { %v1320_v3 = vpack.c.bf16 %v1300_v2, %v1297_v0  ;;  %v2052_v4 = vpop.f32.mrb[35].mxu1  ;;  %v1608_v0 = vld [vmem:[%s2770_s9] sm:$0xf] }
 0x61d   :  { %2078 = vmatmul.mubr.bf16.vlgmr.msra.gmra.mrb[48].mxu0 %v1320_v3  ;;  %v1663_v3 = vld [vmem:[%s2772_s11] sm:$0xff] }
 0x61e   :  { %2081 = vmatprep.mubr.msk.bf16.mxu0 %vm2407_vm0, %v2406_v40 }
 0x620   :  { %v1305_v5 = vpop.f32.mrb[36].mxu1 }
 0x621   :  { %v2055_v6 = vpop.f32.mrb[37].mxu1 }
 0x622   :  { %v1308_v7 = vpop.f32.mrb[38].mxu1 }
 0x623   :  { %v1321_v8 = vpack.c.bf16 %v1308_v7, %v1305_v5  ;;  %v2056_v24 = vpop.f32.mrb[39].mxu1 }
 0x625   :  { %2082 = vmatmul.mubr.bf16.gmra.mrb[52].mxu0 %v1321_v8 }
 0x626   :  { %2085 = vmatprep.mubr.msk.bf16.mxu0 %vm2407_vm0, %v2406_v40 }
 0x628   :  { %v1313_v9 = vpop.f32.mrb[40].mxu1 }
 0x629   :  { %v2059_v25 = vpop.f32.mrb[41].mxu1 }
 0x62a   :  { %v1316_v26 = vpop.f32.mrb[42].mxu1 }
 0x62b   :  { %v1322_v29 = vpack.c.bf16 %v1316_v26, %v1313_v9  ;;  %v2060_v10 = vpop.f32.mrb[43].mxu1 }
 0x62d   :  { %2086 = vmatmul.mubr.bf16.gmra.mrb[56].mxu0 %v1322_v29 }
 0x62e   :  { %2123 = vmatprep.mubr.msk.bf16.mxu0 %vm2407_vm0, %v2406_v40 }
 0x638   :  { %v1566_v11 = vpop.f32.mrb[44].mxu1 }
 0x639   :  { %v2107_v12 = vpop.f32.mrb[45].mxu1 }
 0x63a   :  { %v1569_v13 = vpop.f32.mrb[46].mxu1 }
 0x63b   :  { %v2108_v14 = vpop.f32.mrb[47].mxu1 }
 0x640   :  { %v1574_v34 = vpop.f32.mrb[48].mxu1 }
 0x641   :  { %v2111_v15 = vpop.f32.mrb[49].mxu1 }
 0x642   :  { %v1577_v35 = vpop.f32.mrb[50].mxu1 }
 0x643   :  { %v2112_v16 = vpop.f32.mrb[51].mxu1 }
 0x648   :  { %v1582_v36 = vpop.f32.mrb[52].mxu1 }
 0x649   :  { %v2115_v17 = vpop.f32.mrb[53].mxu1 }
 0x64a   :  { %v1585_v18 = vpop.f32.mrb[54].mxu1 }
 0x64b   :  { %v2116_v39 = vpop.f32.mrb[55].mxu1 }
 0x6f0   :  { %v1443_v21 = vpop.f32.mrb[48].mxu0 }
 0x6f1   :  { %v1567_v23 = vadd.f32 %v1566_v11, %v1443_v21  ;;  %v2079_v27 = vpop.f32.mrb[49].mxu0 }
 0x6f2   :  { %v1446_v44 = vpop.f32.mrb[50].mxu0 }
 0x6f3   :  { %v1596_v28 = vadd.f32 %v1754_v22, %v1567_v23  ;;  %v1570_v45 = vadd.f32 %v1569_v13, %v1446_v44  ;;  %v2080_v30 = vpop.f32.mrb[51].mxu0 }
 0x6f5   :  { %v1597_v46 = vadd.f32 %v1754_v22, %v1570_v45  ;;  %v1602_v31 = vmax.f32 %v1596_v28, 0.0 }
 0x6f7   :  { %v1603_v32 = vmax.f32 %v1597_v46, 0.0 }
 0x6f8   :  { %v1451_v49 = vpop.f32.mrb[52].mxu0 }
 0x6f9   :  { %v1609_v33 = vpack.c.bf16 %v1603_v32, %v1602_v31  ;;  %v1575_v37 = vadd.f32 %v1574_v34, %v1451_v49  ;;  %v2083_v38 = vpop.f32.mrb[53].mxu0 }
 0x6fa   :  { %v1454_v41 = vpop.f32.mrb[54].mxu0 }
 0x6fb   :  { %v1598_v42 = vadd.f32 %v1754_v22, %v1575_v37  ;;  %v1578_v43 = vadd.f32 %v1577_v35, %v1454_v41  ;;  %v2084_v54 = vpop.f32.mrb[55].mxu0  ;;  %2118 = vmatpush3.bf16.msra.mxu0 %v1609_v33 }
 0x6fc   :  { %2119 = vmatprep.subr.bf16.mxu0 %v2406_v40 }
 0x6fd   :  { %v1599_v55 = vadd.f32 %v1754_v22, %v1578_v43  ;;  %v1604_v56 = vmax.f32 %v1598_v42, 0.0 }
 0x6ff   :  { %v1605_v59 = vmax.f32 %v1599_v55, 0.0 }
 0x700   :  { %v1459_v47 = vpop.f32.mrb[56].mxu0 }
 0x701   :  { %v1610_v48 = vpack.c.bf16 %v1605_v59, %v1604_v56  ;;  %v1583_v50 = vadd.f32 %v1582_v36, %v1459_v47  ;;  %v2087_v51 = vpop.f32.mrb[57].mxu0 }
 0x702   :  { %v1462_v52 = vpop.f32.mrb[58].mxu0 }
 0x703   :  { %v1600_v53 = vadd.f32 %v1754_v22, %v1583_v50  ;;  %v1586_v57 = vadd.f32 %v1585_v18, %v1462_v52  ;;  %v2088_v58 = vpop.f32.mrb[59].mxu0  ;;  %2120 = vmatpush3.bf16.msra.mxu0 %v1610_v48 }
 0x704   :  { %2121 = vmatprep.subr.bf16.mxu0 %v2406_v40 }
 0x705   :  { %v1601_v60 = vadd.f32 %v1754_v22, %v1586_v57  ;;  %v1606_v61 = vmax.f32 %v1600_v53, 0.0 }
 0x707   :  { %v1607_v62 = vmax.f32 %v1601_v60, 0.0 }
 0x709   :  { %v1611_v63 = vpack.c.bf16 %v1607_v62, %v1606_v61 }
 0x70b   :  { %2122 = vmatpush3.bf16.msra.mxu0 %v1611_v63 }
 0x70e   :  { %2124 = vmatmul.mubr.msk.bf16.vlgmr.msra.gmra.mrb[60].mxu0 %vm1612_vm1, %v1608_v0 }
 0x7e1   :  { %v1650_v2 = vpop.f32.mrb[60].mxu0 }
 0x7e2   :  { %v2125_v40 = vpop.f32.mrb[61].mxu0  ;;  %v1662_v4 = vmul.f32 %v1660_v1, %v1650_v2 }
 0x7e3   :  { %v1653_v5 = vpop.f32.mrb[62].mxu0 }
 0x7e4   :  { %v1664_v6 = vadd.f32 %v1663_v3, %v1662_v4  ;;  %v2126_v7 = vpop.f32.mrb[63].mxu0 }
 0x7e6   :  { %1665 = vst [vmem:[#allocation16] sm:$0xff] %v1664_v6 }
 0x7e7   :  { %2376 = shalt.err (!%p2373_p4)
}
 0x7e8   :  { %s2377_s11 = scalar_lea.hbm %s2773_s12, 128 }
 0x7e9   :  { %p2378_p5 = scmp.ne.s32.totalorder %s2773_s12, %s2377_s11  ;;  %p2381_p6 = scmp.lt.u32.totalorder %s2377_s11, %s2773_s12 }
 0x7eb   :  { %p2383_p7 = pnand %p2381_p6, %p2378_p5 }
 0x7ed   :  { %2386 = shalt.err (!%p2383_p7)
}
 0x7ee   :  { %1675 = dma.vmem_to_hbm [thread:$0]  %s1673_s20, 128, %s2773_s12, [#allocation6]  }
 0x7ef   :  { %2395 = dma.done.wait [#allocation6], 128  }
 0x7f0   :  { %2396 = vsyncadd [#allocation6], 4294967168 }
 0x7f1   :  { %1679 = vsyncpa [#allocation5], 1 }
 0x7f2   :  { %1680 = vsyncpa [#allocation8], 1 }
 0x7f3   :  { %1681 = vsyncpa [#allocation11], 1 }
 0x7f4   :  { %1682 = vsyncpa [#allocation14], 1 }
 0x7f5   :  { %1683 = vsyncpa [#allocation6], 1 }

</bundles_post_ra>
